<compile_context>
chip_gen: v7x
topology: tpu7x:2x2x1
jax: 0.10.0
libtpu: 0.0.40
codegen_flags: <defaults>
</compile_context>

<pallas_src>
import jax
import jax.numpy as jnp
from jax import lax
from jax.experimental import pallas as pl
from jax.experimental.pallas import tpu as pltpu


# ------------------------------------------------------------------ kernel --
def bilstm_kernel(ids_ref,                      # SMEM (T,) int32 token ids
                  emb_ref,                      # (V, E)   embedding table
                  wx_ref,                       # (2E, 8H) block-diag input proj
                  wh_ref,                       # (2H, 8H) block-diag recurrent
                  b_ref,                        # (1, 8H)  fused bias
                  h0_ref, c0_ref,               # (1, 2H)  [fwd | bwd]
                  wtag_ref, btag_ref,           # (2H, P), (1, P)  lane-padded
                  out_ref,                      # (T, P)
                  embx_ref,                     # scratch (T, 2E): [x_t | x_{T-1-t}]
                  gx_ref,                       # scratch (T, 8H): fused input gates
                  hid_ref):                     # scratch (T, 2H): [h_f(t) | h_b(t)]
    T = out_ref.shape[0]
    E = emb_ref.shape[1]
    H2 = wh_ref.shape[0]          # 2H (both directions)
    H = H2 // 2                   # per-direction hidden

    # ---- fused embedding gather: row t = [x_t | x_{T-1-t}] -----------------
    # ids come from SMEM; emb rows are dynamic-sublane loads from VMEM.
    for t in range(T):
        embx_ref[t:t + 1, 0:E] = emb_ref[pl.ds(ids_ref[t], 1), :]
        embx_ref[t:t + 1, E:2 * E] = emb_ref[pl.ds(ids_ref[T - 1 - t], 1), :]

    # ---- fused input projection: ONE (T,2E)@(2E,8H) MXU matmul -------------
    gx_ref[...] = (jnp.dot(embx_ref[...], wx_ref[...],
                           preferred_element_type=jnp.float32) + b_ref[...])

    wh = wh_ref[...]

    # ---- fused fwd+bwd recurrence: one 128-lane gate row per step ----------
    def body(t, carry):
        h, c = carry                                   # (1, 2H) each
        rt = T - 1 - t
        g = gx_ref[pl.ds(t, 1), :] + jnp.dot(
            h, wh, preferred_element_type=jnp.float32)  # (1, 8H)
        # gate layout: [i_f i_b | f_f f_b | o_f o_b | g_f g_b], blocks of H
        sig = jax.nn.sigmoid(g[:, 0:3 * H2])            # one EUP push, 3*2H lanes
        i = sig[:, 0:H2]
        f = sig[:, H2:2 * H2]
        o = sig[:, 2 * H2:3 * H2]
        gg = jnp.tanh(g[:, 3 * H2:4 * H2])              # one tanh, 2H lanes
        c_new = f * c + i * gg
        h_new = o * jnp.tanh(c_new)
        # fwd half -> time t, bwd half -> reversed time position rt
        hid_ref[pl.ds(t, 1), 0:H] = h_new[:, 0:H]
        hid_ref[pl.ds(rt, 1), H:H2] = h_new[:, H:H2]
        return (h_new, c_new)

    unroll = True if T <= 32 else 8
    lax.fori_loop(0, T, body, (h0_ref[...], c0_ref[...]), unroll=unroll)

    # ---- hidden2tag: one (T,2H)@(2H,P) dot, lane-dense output store --------
    out_ref[...] = (jnp.dot(hid_ref[...], wtag_ref[...],
                            preferred_element_type=jnp.float32) + btag_ref[...])


# ---------------------------------------------------------- param prep ------
def prepare_params(params):
    """One-time prep: gate reorder, direction lane-fusion, block-diagonal
    weights, bias sums, lane padding of the tag projection."""
    H = params["hidden_dim"] // 2
    H2 = 2 * H
    E = params["emb"].shape[1]
    tagset = params["b_tag"].shape[0]
    P = max(128, ((tagset + 127) // 128) * 128)    # lane-dense output width

    def gate_blocks(w_t):
        # PyTorch gate order along the 4H axis is [i, f, g, o]
        return (w_t[:, 0:H], w_t[:, H:2 * H], w_t[:, 2 * H:3 * H], w_t[:, 3 * H:4 * H])

    i_f, f_f, g_f, o_f = gate_blocks(params["wih_f"].T)      # (E, H) each
    i_b, f_b, g_b, o_b = gate_blocks(params["wih_b"].T)
    hi_f, hf_f, hg_f, ho_f = gate_blocks(params["whh_f"].T)  # (H, H) each
    hi_b, hf_b, hg_b, ho_b = gate_blocks(params["whh_b"].T)

    Ze = jnp.zeros((E, H), jnp.float32)
    Zh = jnp.zeros((H, H), jnp.float32)

    # fused gate column layout (8 blocks of H): [i_f i_b f_f f_b o_f o_b g_f g_b]
    wx_top = jnp.concatenate([i_f, Ze, f_f, Ze, o_f, Ze, g_f, Ze], axis=1)   # (E, 8H)
    wx_bot = jnp.concatenate([Ze, i_b, Ze, f_b, Ze, o_b, Ze, g_b], axis=1)   # (E, 8H)
    wx = jnp.concatenate([wx_top, wx_bot], axis=0)                           # (2E, 8H)

    wh_top = jnp.concatenate([hi_f, Zh, hf_f, Zh, ho_f, Zh, hg_f, Zh], axis=1)
    wh_bot = jnp.concatenate([Zh, hi_b, Zh, hf_b, Zh, ho_b, Zh, hg_b], axis=1)
    wh = jnp.concatenate([wh_top, wh_bot], axis=0)                           # (2H, 8H)

    def bias_blocks(b):
        return (b[0:H], b[H:2 * H], b[2 * H:3 * H], b[3 * H:4 * H])

    bi_f, bf_f, bg_f, bo_f = bias_blocks(params["bih_f"] + params["bhh_f"])
    bi_b, bf_b, bg_b, bo_b = bias_blocks(params["bih_b"] + params["bhh_b"])
    b = jnp.concatenate(
        [bi_f, bi_b, bf_f, bf_b, bo_f, bo_b, bg_f, bg_b])[None, :]           # (1, 8H)

    wtag_t = params["w_tag"].T                                               # (2H, tagset)
    wtag = jnp.zeros((H2, P), jnp.float32).at[:, :tagset].set(wtag_t)
    btag = jnp.zeros((1, P), jnp.float32).at[:, :tagset].set(params["b_tag"])

    h0 = params["h0"][:, 0, :].reshape(1, H2)    # [h0_f | h0_b]
    c0 = params["c0"][:, 0, :].reshape(1, H2)    # [c0_f | c0_b]

    return {
        "emb": params["emb"].astype(jnp.float32),
        "wx": wx, "wh": wh, "b": b,
        "h0": h0, "c0": c0,
        "wtag": wtag, "btag": btag,
        "tagset": tagset, "P": P,
    }


# ----------------------------------------------------------------- wrapper --
def bilstm_forward(sentence, prepped):
    """sentence: (T,) int32 token ids. Returns (T, tagset_size) float32."""
    T = sentence.shape[0]
    E = prepped["emb"].shape[1]
    H2 = prepped["wh"].shape[0]
    G = prepped["wx"].shape[1]
    P = prepped["P"]

    vmem = pl.BlockSpec(memory_space=pltpu.MemorySpace.VMEM)
    smem = pl.BlockSpec(memory_space=pltpu.MemorySpace.SMEM)

    out = pl.pallas_call(
        bilstm_kernel,
        out_shape=jax.ShapeDtypeStruct((T, P), jnp.float32),
        in_specs=[smem,                      # token ids
                  vmem, vmem, vmem, vmem,    # emb, wx, wh, b
                  vmem, vmem,                # h0, c0
                  vmem, vmem],               # wtag, btag
        out_specs=vmem,
        scratch_shapes=[pltpu.VMEM((T, 2 * E), jnp.float32),   # embx
                        pltpu.VMEM((T, G), jnp.float32),       # gx (lane-dense 8H)
                        pltpu.VMEM((T, H2), jnp.float32)],     # hid
    )(sentence.astype(jnp.int32),
      prepped["emb"], prepped["wx"], prepped["wh"], prepped["b"],
      prepped["h0"], prepped["c0"],
      prepped["wtag"], prepped["btag"])
    return out[:, :prepped["tagset"]]


# -------------------------------------------------------------- reference --
def bilstm_reference(sentence, params):
    H = params["hidden_dim"] // 2
    embeds = params["emb"][sentence]

    def run(seq, wih, whh, bih, bhh, h0, c0):
        def step(carry, x):
            h, c = carry
            gates = x @ wih.T + bih + h @ whh.T + bhh
            i = jax.nn.sigmoid(gates[0 * H:1 * H])
            f = jax.nn.sigmoid(gates[1 * H:2 * H])
            g = jnp.tanh(gates[2 * H:3 * H])
            o = jax.nn.sigmoid(gates[3 * H:4 * H])
            c = f * c + i * g
            h = o * jnp.tanh(c)
            return (h, c), h
        _, hs = lax.scan(step, (h0, c0), seq)
        return hs

    hf = run(embeds, params["wih_f"], params["whh_f"], params["bih_f"],
             params["bhh_f"], params["h0"][0, 0], params["c0"][0, 0])
    hb = run(embeds[::-1], params["wih_b"], params["whh_b"], params["bih_b"],
             params["bhh_b"], params["h0"][1, 0], params["c0"][1, 0])[::-1]
    lstm_out = jnp.concatenate([hf, hb], axis=1)
    return lstm_out @ params["w_tag"].T + params["b_tag"]


# ------------------------------------------------------------------- main --
if __name__ == "__main__":
    vocab_size = 20
    embedding_dim = 32
    hidden_dim = 32          # per-direction hidden = 16  ->  8H = 128 lanes
    tag_to_ix = {"O": 0, "B-PER": 1, "I-PER": 2, "B-LOC": 3, "I-LOC": 4}
    tagset_size = len(tag_to_ix)
    seq_len = 8
    H = hidden_dim // 2

    key = jax.random.PRNGKey(0)
    keys = jax.random.split(key, 16)

    def u(k, shape, scale=0.1):
        return jax.random.uniform(k, shape, jnp.float32, -scale, scale)

    params = {
        "hidden_dim": hidden_dim,
        "emb":   u(keys[0], (vocab_size, embedding_dim), 1.0),
        # forward-direction LSTM (PyTorch param shapes, gate order [i,f,g,o])
        "wih_f": u(keys[1], (4 * H, embedding_dim)),
        "whh_f": u(keys[2], (4 * H, H)),
        "bih_f": u(keys[3], (4 * H,)),
        "bhh_f": u(keys[4], (4 * H,)),
        # backward-direction LSTM
        "wih_b": u(keys[5], (4 * H, embedding_dim)),
        "whh_b": u(keys[6], (4 * H, H)),
        "bih_b": u(keys[7], (4 * H,)),
        "bhh_b": u(keys[8], (4 * H,)),
        # hidden2tag
        "w_tag": u(keys[9], (tagset_size, hidden_dim)),
        "b_tag": u(keys[10], (tagset_size,)),
        # self.hidden = (randn(2,1,H), randn(2,1,H))
        "h0": jax.random.normal(keys[11], (2, 1, H), jnp.float32),
        "c0": jax.random.normal(keys[12], (2, 1, H), jnp.float32),
    }

    sentence = jax.random.randint(keys[13], (seq_len,), 0, vocab_size,
                                  dtype=jnp.int32)

    prepped = prepare_params(params)              # one-time weight prep
    prepped = jax.tree_util.tree_map(
        lambda x: jax.block_until_ready(x) if isinstance(x, jax.Array) else x,
        prepped)

    out = bilstm_forward(sentence, prepped)
    out = jax.block_until_ready(out)

    ref = bilstm_reference(sentence, params)
    assert out.shape == (seq_len, tagset_size)
    assert jnp.allclose(out, ref, rtol=1e-4, atol=1e-4), (
        f"max abs diff = {jnp.max(jnp.abs(out - ref))}")

    print("KERNEL_OK")
</pallas_src>

<mosaic_0001>
module attributes {stable_mosaic.version = 11 : i64} {
  func.func @bilstm_kernel(%arg0: memref<8xi32, #tpu.memory_space<smem>>, %arg1: memref<20x32xf32, #tpu.memory_space<vmem>>, %arg2: memref<64x128xf32, #tpu.memory_space<vmem>>, %arg3: memref<32x128xf32, #tpu.memory_space<vmem>>, %arg4: memref<1x128xf32, #tpu.memory_space<vmem>>, %arg5: memref<1x32xf32, #tpu.memory_space<vmem>>, %arg6: memref<1x32xf32, #tpu.memory_space<vmem>>, %arg7: memref<32x128xf32, #tpu.memory_space<vmem>>, %arg8: memref<1x128xf32, #tpu.memory_space<vmem>>, %arg9: memref<8x128xf32, #tpu.memory_space<vmem>>, %arg10: memref<8x64xf32, #tpu.memory_space<vmem>>, %arg11: memref<8x128xf32, #tpu.memory_space<vmem>>, %arg12: memref<8x32xf32, #tpu.memory_space<vmem>>) attributes {dimension_semantics = [], scalar_prefetch = 0 : i64, scratch_operands = 3 : i64, tpu.core_type = #tpu.core_type<tc>} {
    %c0 = arith.constant 0 : index
    %0 = memref.load %arg0[%c0] : memref<8xi32, #tpu.memory_space<smem>>
    %1 = arith.index_cast %0 : i32 to index
    %c0_0 = arith.constant 0 : index
    %2 = vector.load %arg1[%1, %c0_0] : memref<20x32xf32, #tpu.memory_space<vmem>>, vector<1x32xf32>
    %c0_1 = arith.constant 0 : index
    %c0_2 = arith.constant 0 : index
    %3 = vector.load %arg10[%c0_1, %c0_2] : memref<8x64xf32, #tpu.memory_space<vmem>>, vector<1x32xf32>
    tpu.vector_store %arg10[%c0_1, %c0_2], %2 {strides = array<i32>} : memref<8x64xf32, #tpu.memory_space<vmem>>, vector<1x32xf32>,
    %c7 = arith.constant 7 : index
    %4 = memref.load %arg0[%c7] : memref<8xi32, #tpu.memory_space<smem>>
    %5 = arith.index_cast %4 : i32 to index
    %c0_3 = arith.constant 0 : index
    %6 = vector.load %arg1[%5, %c0_3] : memref<20x32xf32, #tpu.memory_space<vmem>>, vector<1x32xf32>
    %c0_4 = arith.constant 0 : index
    %c32 = arith.constant 32 : index
    %7 = vector.load %arg10[%c0_4, %c32] : memref<8x64xf32, #tpu.memory_space<vmem>>, vector<1x32xf32>
    tpu.vector_store %arg10[%c0_4, %c32], %6 {strides = array<i32>} : memref<8x64xf32, #tpu.memory_space<vmem>>, vector<1x32xf32>,
    %c1 = arith.constant 1 : index
    %8 = memref.load %arg0[%c1] : memref<8xi32, #tpu.memory_space<smem>>
    %9 = arith.index_cast %8 : i32 to index
    %c0_5 = arith.constant 0 : index
    %10 = vector.load %arg1[%9, %c0_5] : memref<20x32xf32, #tpu.memory_space<vmem>>, vector<1x32xf32>
    %c1_6 = arith.constant 1 : index
    %c0_7 = arith.constant 0 : index
    %11 = vector.load %arg10[%c1_6, %c0_7] : memref<8x64xf32, #tpu.memory_space<vmem>>, vector<1x32xf32>
    tpu.vector_store %arg10[%c1_6, %c0_7], %10 {strides = array<i32>} : memref<8x64xf32, #tpu.memory_space<vmem>>, vector<1x32xf32>,
    %c6 = arith.constant 6 : index
    %12 = memref.load %arg0[%c6] : memref<8xi32, #tpu.memory_space<smem>>
    %13 = arith.index_cast %12 : i32 to index
    %c0_8 = arith.constant 0 : index
    %14 = vector.load %arg1[%13, %c0_8] : memref<20x32xf32, #tpu.memory_space<vmem>>, vector<1x32xf32>
    %c1_9 = arith.constant 1 : index
    %c32_10 = arith.constant 32 : index
    %15 = vector.load %arg10[%c1_9, %c32_10] : memref<8x64xf32, #tpu.memory_space<vmem>>, vector<1x32xf32>
    tpu.vector_store %arg10[%c1_9, %c32_10], %14 {strides = array<i32>} : memref<8x64xf32, #tpu.memory_space<vmem>>, vector<1x32xf32>,
    %c2 = arith.constant 2 : index
    %16 = memref.load %arg0[%c2] : memref<8xi32, #tpu.memory_space<smem>>
    %17 = arith.index_cast %16 : i32 to index
    %c0_11 = arith.constant 0 : index
    %18 = vector.load %arg1[%17, %c0_11] : memref<20x32xf32, #tpu.memory_space<vmem>>, vector<1x32xf32>
    %c2_12 = arith.constant 2 : index
    %c0_13 = arith.constant 0 : index
    %19 = vector.load %arg10[%c2_12, %c0_13] : memref<8x64xf32, #tpu.memory_space<vmem>>, vector<1x32xf32>
    tpu.vector_store %arg10[%c2_12, %c0_13], %18 {strides = array<i32>} : memref<8x64xf32, #tpu.memory_space<vmem>>, vector<1x32xf32>,
    %c5 = arith.constant 5 : index
    %20 = memref.load %arg0[%c5] : memref<8xi32, #tpu.memory_space<smem>>
    %21 = arith.index_cast %20 : i32 to index
    %c0_14 = arith.constant 0 : index
    %22 = vector.load %arg1[%21, %c0_14] : memref<20x32xf32, #tpu.memory_space<vmem>>, vector<1x32xf32>
    %c2_15 = arith.constant 2 : index
    %c32_16 = arith.constant 32 : index
    %23 = vector.load %arg10[%c2_15, %c32_16] : memref<8x64xf32, #tpu.memory_space<vmem>>, vector<1x32xf32>
    tpu.vector_store %arg10[%c2_15, %c32_16], %22 {strides = array<i32>} : memref<8x64xf32, #tpu.memory_space<vmem>>, vector<1x32xf32>,
    %c3 = arith.constant 3 : index
    %24 = memref.load %arg0[%c3] : memref<8xi32, #tpu.memory_space<smem>>
    %25 = arith.index_cast %24 : i32 to index
    %c0_17 = arith.constant 0 : index
    %26 = vector.load %arg1[%25, %c0_17] : memref<20x32xf32, #tpu.memory_space<vmem>>, vector<1x32xf32>
    %c3_18 = arith.constant 3 : index
    %c0_19 = arith.constant 0 : index
    %27 = vector.load %arg10[%c3_18, %c0_19] : memref<8x64xf32, #tpu.memory_space<vmem>>, vector<1x32xf32>
    tpu.vector_store %arg10[%c3_18, %c0_19], %26 {strides = array<i32>} : memref<8x64xf32, #tpu.memory_space<vmem>>, vector<1x32xf32>,
    %c4 = arith.constant 4 : index
    %28 = memref.load %arg0[%c4] : memref<8xi32, #tpu.memory_space<smem>>
    %29 = arith.index_cast %28 : i32 to index
    %c0_20 = arith.constant 0 : index
    %30 = vector.load %arg1[%29, %c0_20] : memref<20x32xf32, #tpu.memory_space<vmem>>, vector<1x32xf32>
    %c3_21 = arith.constant 3 : index
    %c32_22 = arith.constant 32 : index
    %31 = vector.load %arg10[%c3_21, %c32_22] : memref<8x64xf32, #tpu.memory_space<vmem>>, vector<1x32xf32>
    tpu.vector_store %arg10[%c3_21, %c32_22], %30 {strides = array<i32>} : memref<8x64xf32, #tpu.memory_space<vmem>>, vector<1x32xf32>,
    %c4_23 = arith.constant 4 : index
    %32 = memref.load %arg0[%c4_23] : memref<8xi32, #tpu.memory_space<smem>>
    %33 = arith.index_cast %32 : i32 to index
    %c0_24 = arith.constant 0 : index
    %34 = vector.load %arg1[%33, %c0_24] : memref<20x32xf32, #tpu.memory_space<vmem>>, vector<1x32xf32>
    %c4_25 = arith.constant 4 : index
    %c0_26 = arith.constant 0 : index
    %35 = vector.load %arg10[%c4_25, %c0_26] : memref<8x64xf32, #tpu.memory_space<vmem>>, vector<1x32xf32>
    tpu.vector_store %arg10[%c4_25, %c0_26], %34 {strides = array<i32>} : memref<8x64xf32, #tpu.memory_space<vmem>>, vector<1x32xf32>,
    %c3_27 = arith.constant 3 : index
    %36 = memref.load %arg0[%c3_27] : memref<8xi32, #tpu.memory_space<smem>>
    %37 = arith.index_cast %36 : i32 to index
    %c0_28 = arith.constant 0 : index
    %38 = vector.load %arg1[%37, %c0_28] : memref<20x32xf32, #tpu.memory_space<vmem>>, vector<1x32xf32>
    %c4_29 = arith.constant 4 : index
    %c32_30 = arith.constant 32 : index
    %39 = vector.load %arg10[%c4_29, %c32_30] : memref<8x64xf32, #tpu.memory_space<vmem>>, vector<1x32xf32>
    tpu.vector_store %arg10[%c4_29, %c32_30], %38 {strides = array<i32>} : memref<8x64xf32, #tpu.memory_space<vmem>>, vector<1x32xf32>,
    %c5_31 = arith.constant 5 : index
    %40 = memref.load %arg0[%c5_31] : memref<8xi32, #tpu.memory_space<smem>>
    %41 = arith.index_cast %40 : i32 to index
    %c0_32 = arith.constant 0 : index
    %42 = vector.load %arg1[%41, %c0_32] : memref<20x32xf32, #tpu.memory_space<vmem>>, vector<1x32xf32>
    %c5_33 = arith.constant 5 : index
    %c0_34 = arith.constant 0 : index
    %43 = vector.load %arg10[%c5_33, %c0_34] : memref<8x64xf32, #tpu.memory_space<vmem>>, vector<1x32xf32>
    tpu.vector_store %arg10[%c5_33, %c0_34], %42 {strides = array<i32>} : memref<8x64xf32, #tpu.memory_space<vmem>>, vector<1x32xf32>,
    %c2_35 = arith.constant 2 : index
    %44 = memref.load %arg0[%c2_35] : memref<8xi32, #tpu.memory_space<smem>>
    %45 = arith.index_cast %44 : i32 to index
    %c0_36 = arith.constant 0 : index
    %46 = vector.load %arg1[%45, %c0_36] : memref<20x32xf32, #tpu.memory_space<vmem>>, vector<1x32xf32>
    %c5_37 = arith.constant 5 : index
    %c32_38 = arith.constant 32 : index
    %47 = vector.load %arg10[%c5_37, %c32_38] : memref<8x64xf32, #tpu.memory_space<vmem>>, vector<1x32xf32>
    tpu.vector_store %arg10[%c5_37, %c32_38], %46 {strides = array<i32>} : memref<8x64xf32, #tpu.memory_space<vmem>>, vector<1x32xf32>,
    %c6_39 = arith.constant 6 : index
    %48 = memref.load %arg0[%c6_39] : memref<8xi32, #tpu.memory_space<smem>>
    %49 = arith.index_cast %48 : i32 to index
    %c0_40 = arith.constant 0 : index
    %50 = vector.load %arg1[%49, %c0_40] : memref<20x32xf32, #tpu.memory_space<vmem>>, vector<1x32xf32>
    %c6_41 = arith.constant 6 : index
    %c0_42 = arith.constant 0 : index
    %51 = vector.load %arg10[%c6_41, %c0_42] : memref<8x64xf32, #tpu.memory_space<vmem>>, vector<1x32xf32>
    tpu.vector_store %arg10[%c6_41, %c0_42], %50 {strides = array<i32>} : memref<8x64xf32, #tpu.memory_space<vmem>>, vector<1x32xf32>,
    %c1_43 = arith.constant 1 : index
    %52 = memref.load %arg0[%c1_43] : memref<8xi32, #tpu.memory_space<smem>>
    %53 = arith.index_cast %52 : i32 to index
    %c0_44 = arith.constant 0 : index
    %54 = vector.load %arg1[%53, %c0_44] : memref<20x32xf32, #tpu.memory_space<vmem>>, vector<1x32xf32>
    %c6_45 = arith.constant 6 : index
    %c32_46 = arith.constant 32 : index
    %55 = vector.load %arg10[%c6_45, %c32_46] : memref<8x64xf32, #tpu.memory_space<vmem>>, vector<1x32xf32>
    tpu.vector_store %arg10[%c6_45, %c32_46], %54 {strides = array<i32>} : memref<8x64xf32, #tpu.memory_space<vmem>>, vector<1x32xf32>,
    %c7_47 = arith.constant 7 : index
    %56 = memref.load %arg0[%c7_47] : memref<8xi32, #tpu.memory_space<smem>>
    %57 = arith.index_cast %56 : i32 to index
    %c0_48 = arith.constant 0 : index
    %58 = vector.load %arg1[%57, %c0_48] : memref<20x32xf32, #tpu.memory_space<vmem>>, vector<1x32xf32>
    %c7_49 = arith.constant 7 : index
    %c0_50 = arith.constant 0 : index
    %59 = vector.load %arg10[%c7_49, %c0_50] : memref<8x64xf32, #tpu.memory_space<vmem>>, vector<1x32xf32>
    tpu.vector_store %arg10[%c7_49, %c0_50], %58 {strides = array<i32>} : memref<8x64xf32, #tpu.memory_space<vmem>>, vector<1x32xf32>,
    %c0_51 = arith.constant 0 : index
    %60 = memref.load %arg0[%c0_51] : memref<8xi32, #tpu.memory_space<smem>>
    %61 = arith.index_cast %60 : i32 to index
    %c0_52 = arith.constant 0 : index
    %62 = vector.load %arg1[%61, %c0_52] : memref<20x32xf32, #tpu.memory_space<vmem>>, vector<1x32xf32>
    %c7_53 = arith.constant 7 : index
    %c32_54 = arith.constant 32 : index
    %63 = vector.load %arg10[%c7_53, %c32_54] : memref<8x64xf32, #tpu.memory_space<vmem>>, vector<1x32xf32>
    tpu.vector_store %arg10[%c7_53, %c32_54], %62 {strides = array<i32>} : memref<8x64xf32, #tpu.memory_space<vmem>>, vector<1x32xf32>,
    %c0_55 = arith.constant 0 : index
    %c0_56 = arith.constant 0 : index
    %64 = vector.load %arg10[%c0_55, %c0_56] : memref<8x64xf32, #tpu.memory_space<vmem>>, vector<8x64xf32>
    %c0_57 = arith.constant 0 : index
    %c0_58 = arith.constant 0 : index
    %65 = vector.load %arg2[%c0_57, %c0_58] : memref<64x128xf32, #tpu.memory_space<vmem>>, vector<64x128xf32>
    %cst = arith.constant dense<0.000000e+00> : vector<8x128xf32>
    %66 = tpu.matmul %64, %65, %cst {dimension_numbers = #tpu.dot_dimension_numbers<[1], [0], [0], [1], [0, 0, 1, 1], [], []>} : vector<8x64xf32>, vector<64x128xf32>, vector<8x128xf32> -> vector<8x128xf32>
    %c0_59 = arith.constant 0 : index
    %c0_60 = arith.constant 0 : index
    %67 = vector.load %arg4[%c0_59, %c0_60] : memref<1x128xf32, #tpu.memory_space<vmem>>, vector<1x128xf32>
    %68 = vector.broadcast %67 : vector<1x128xf32> to vector<8x128xf32>
    %69 = arith.addf %66, %68 : vector<8x128xf32>
    %c0_61 = arith.constant 0 : index
    %c0_62 = arith.constant 0 : index
    %70 = vector.load %arg11[%c0_61, %c0_62] : memref<8x128xf32, #tpu.memory_space<vmem>>, vector<8x128xf32>
    tpu.vector_store %arg11[%c0_61, %c0_62], %69 {strides = array<i32>} : memref<8x128xf32, #tpu.memory_space<vmem>>, vector<8x128xf32>,
    %c0_63 = arith.constant 0 : index
    %c0_64 = arith.constant 0 : index
    %71 = vector.load %arg3[%c0_63, %c0_64] : memref<32x128xf32, #tpu.memory_space<vmem>>, vector<32x128xf32>
    %c0_65 = arith.constant 0 : index
    %c0_66 = arith.constant 0 : index
    %72 = vector.load %arg5[%c0_65, %c0_66] : memref<1x32xf32, #tpu.memory_space<vmem>>, vector<1x32xf32>
    %c0_67 = arith.constant 0 : index
    %c0_68 = arith.constant 0 : index
    %73 = vector.load %arg6[%c0_67, %c0_68] : memref<1x32xf32, #tpu.memory_space<vmem>>, vector<1x32xf32>
    %c0_i32 = arith.constant 0 : i32
    %c7_i32 = arith.constant 7 : i32
    %74 = arith.subi %c7_i32, %c0_i32 : i32
    %75 = arith.index_cast %c0_i32 : i32 to index
    %c0_69 = arith.constant 0 : index
    %76 = vector.load %arg11[%75, %c0_69] : memref<8x128xf32, #tpu.memory_space<vmem>>, vector<1x128xf32>
    %cst_70 = arith.constant dense<0.000000e+00> : vector<1x128xf32>
    %77 = tpu.matmul %72, %71, %cst_70 {dimension_numbers = #tpu.dot_dimension_numbers<[1], [0], [0], [1], [0, 0, 1, 1], [], []>} : vector<1x32xf32>, vector<32x128xf32>, vector<1x128xf32> -> vector<1x128xf32>
    %78 = arith.addf %76, %77 : vector<1x128xf32>
    %79 = vector.extract_strided_slice %78 {offsets = [0, 0], sizes = [1, 96], strides = [1, 1]} : vector<1x128xf32> to vector<1x96xf32>
    %80 = arith.negf %79 : vector<1x96xf32>
    %81 = math.exp %80 : vector<1x96xf32>
    %cst_71 = arith.constant 1.000000e+00 : f32
    %82 = vector.broadcast %cst_71 : f32 to vector<1x96xf32>
    %83 = arith.addf %82, %81 : vector<1x96xf32>
    %84 = arith.divf %82, %83 : vector<1x96xf32>
    %85 = vector.extract_strided_slice %84 {offsets = [0, 0], sizes = [1, 32], strides = [1, 1]} : vector<1x96xf32> to vector<1x32xf32>
    %86 = vector.extract_strided_slice %84 {offsets = [0, 32], sizes = [1, 32], strides = [1, 1]} : vector<1x96xf32> to vector<1x32xf32>
    %87 = vector.extract_strided_slice %84 {offsets = [0, 64], sizes = [1, 32], strides = [1, 1]} : vector<1x96xf32> to vector<1x32xf32>
    %88 = vector.extract_strided_slice %78 {offsets = [0, 96], sizes = [1, 32], strides = [1, 1]} : vector<1x128xf32> to vector<1x32xf32>
    %89 = math.tanh %88 : vector<1x32xf32>
    %90 = arith.mulf %86, %73 : vector<1x32xf32>
    %91 = arith.mulf %85, %89 : vector<1x32xf32>
    %92 = arith.addf %90, %91 : vector<1x32xf32>
    %93 = math.tanh %92 : vector<1x32xf32>
    %94 = arith.mulf %87, %93 : vector<1x32xf32>
    %95 = vector.extract_strided_slice %94 {offsets = [0, 0], sizes = [1, 16], strides = [1, 1]} : vector<1x32xf32> to vector<1x16xf32>
    %96 = arith.index_cast %c0_i32 : i32 to index
    %c0_72 = arith.constant 0 : index
    %97 = vector.load %arg12[%96, %c0_72] : memref<8x32xf32, #tpu.memory_space<vmem>>, vector<1x16xf32>
    tpu.vector_store %arg12[%96, %c0_72], %95 {strides = array<i32>} : memref<8x32xf32, #tpu.memory_space<vmem>>, vector<1x16xf32>,
    %98 = vector.extract_strided_slice %94 {offsets = [0, 16], sizes = [1, 16], strides = [1, 1]} : vector<1x32xf32> to vector<1x16xf32>
    %99 = arith.index_cast %74 : i32 to index
    %c16 = arith.constant 16 : index
    %100 = vector.load %arg12[%99, %c16] : memref<8x32xf32, #tpu.memory_space<vmem>>, vector<1x16xf32>
    tpu.vector_store %arg12[%99, %c16], %98 {strides = array<i32>} : memref<8x32xf32, #tpu.memory_space<vmem>>, vector<1x16xf32>,
    %c1_i32 = arith.constant 1 : i32
    %c7_i32_73 = arith.constant 7 : i32
    %101 = arith.subi %c7_i32_73, %c1_i32 : i32
    %102 = arith.index_cast %c1_i32 : i32 to index
    %c0_74 = arith.constant 0 : index
    %103 = vector.load %arg11[%102, %c0_74] : memref<8x128xf32, #tpu.memory_space<vmem>>, vector<1x128xf32>
    %cst_75 = arith.constant dense<0.000000e+00> : vector<1x128xf32>
    %104 = tpu.matmul %94, %71, %cst_75 {dimension_numbers = #tpu.dot_dimension_numbers<[1], [0], [0], [1], [0, 0, 1, 1], [], []>} : vector<1x32xf32>, vector<32x128xf32>, vector<1x128xf32> -> vector<1x128xf32>
    %105 = arith.addf %103, %104 : vector<1x128xf32>
    %106 = vector.extract_strided_slice %105 {offsets = [0, 0], sizes = [1, 96], strides = [1, 1]} : vector<1x128xf32> to vector<1x96xf32>
    %107 = arith.negf %106 : vector<1x96xf32>
    %108 = math.exp %107 : vector<1x96xf32>
    %cst_76 = arith.constant 1.000000e+00 : f32
    %109 = vector.broadcast %cst_76 : f32 to vector<1x96xf32>
    %110 = arith.addf %109, %108 : vector<1x96xf32>
    %111 = arith.divf %109, %110 : vector<1x96xf32>
    %112 = vector.extract_strided_slice %111 {offsets = [0, 0], sizes = [1, 32], strides = [1, 1]} : vector<1x96xf32> to vector<1x32xf32>
    %113 = vector.extract_strided_slice %111 {offsets = [0, 32], sizes = [1, 32], strides = [1, 1]} : vector<1x96xf32> to vector<1x32xf32>
    %114 = vector.extract_strided_slice %111 {offsets = [0, 64], sizes = [1, 32], strides = [1, 1]} : vector<1x96xf32> to vector<1x32xf32>
    %115 = vector.extract_strided_slice %105 {offsets = [0, 96], sizes = [1, 32], strides = [1, 1]} : vector<1x128xf32> to vector<1x32xf32>
    %116 = math.tanh %115 : vector<1x32xf32>
    %117 = arith.mulf %113, %92 : vector<1x32xf32>
    %118 = arith.mulf %112, %116 : vector<1x32xf32>
    %119 = arith.addf %117, %118 : vector<1x32xf32>
    %120 = math.tanh %119 : vector<1x32xf32>
    %121 = arith.mulf %114, %120 : vector<1x32xf32>
    %122 = vector.extract_strided_slice %121 {offsets = [0, 0], sizes = [1, 16], strides = [1, 1]} : vector<1x32xf32> to vector<1x16xf32>
    %123 = arith.index_cast %c1_i32 : i32 to index
    %c0_77 = arith.constant 0 : index
    %124 = vector.load %arg12[%123, %c0_77] : memref<8x32xf32, #tpu.memory_space<vmem>>, vector<1x16xf32>
    tpu.vector_store %arg12[%123, %c0_77], %122 {strides = array<i32>} : memref<8x32xf32, #tpu.memory_space<vmem>>, vector<1x16xf32>,
    %125 = vector.extract_strided_slice %121 {offsets = [0, 16], sizes = [1, 16], strides = [1, 1]} : vector<1x32xf32> to vector<1x16xf32>
    %126 = arith.index_cast %101 : i32 to index
    %c16_78 = arith.constant 16 : index
    %127 = vector.load %arg12[%126, %c16_78] : memref<8x32xf32, #tpu.memory_space<vmem>>, vector<1x16xf32>
    tpu.vector_store %arg12[%126, %c16_78], %125 {strides = array<i32>} : memref<8x32xf32, #tpu.memory_space<vmem>>, vector<1x16xf32>,
    %c2_i32 = arith.constant 2 : i32
    %c7_i32_79 = arith.constant 7 : i32
    %128 = arith.subi %c7_i32_79, %c2_i32 : i32
    %129 = arith.index_cast %c2_i32 : i32 to index
    %c0_80 = arith.constant 0 : index
    %130 = vector.load %arg11[%129, %c0_80] : memref<8x128xf32, #tpu.memory_space<vmem>>, vector<1x128xf32>
    %cst_81 = arith.constant dense<0.000000e+00> : vector<1x128xf32>
    %131 = tpu.matmul %121, %71, %cst_81 {dimension_numbers = #tpu.dot_dimension_numbers<[1], [0], [0], [1], [0, 0, 1, 1], [], []>} : vector<1x32xf32>, vector<32x128xf32>, vector<1x128xf32> -> vector<1x128xf32>
    %132 = arith.addf %130, %131 : vector<1x128xf32>
    %133 = vector.extract_strided_slice %132 {offsets = [0, 0], sizes = [1, 96], strides = [1, 1]} : vector<1x128xf32> to vector<1x96xf32>
    %134 = arith.negf %133 : vector<1x96xf32>
    %135 = math.exp %134 : vector<1x96xf32>
    %cst_82 = arith.constant 1.000000e+00 : f32
    %136 = vector.broadcast %cst_82 : f32 to vector<1x96xf32>
    %137 = arith.addf %136, %135 : vector<1x96xf32>
    %138 = arith.divf %136, %137 : vector<1x96xf32>
    %139 = vector.extract_strided_slice %138 {offsets = [0, 0], sizes = [1, 32], strides = [1, 1]} : vector<1x96xf32> to vector<1x32xf32>
    %140 = vector.extract_strided_slice %138 {offsets = [0, 32], sizes = [1, 32], strides = [1, 1]} : vector<1x96xf32> to vector<1x32xf32>
    %141 = vector.extract_strided_slice %138 {offsets = [0, 64], sizes = [1, 32], strides = [1, 1]} : vector<1x96xf32> to vector<1x32xf32>
    %142 = vector.extract_strided_slice %132 {offsets = [0, 96], sizes = [1, 32], strides = [1, 1]} : vector<1x128xf32> to vector<1x32xf32>
    %143 = math.tanh %142 : vector<1x32xf32>
    %144 = arith.mulf %140, %119 : vector<1x32xf32>
    %145 = arith.mulf %139, %143 : vector<1x32xf32>
    %146 = arith.addf %144, %145 : vector<1x32xf32>
    %147 = math.tanh %146 : vector<1x32xf32>
    %148 = arith.mulf %141, %147 : vector<1x32xf32>
    %149 = vector.extract_strided_slice %148 {offsets = [0, 0], sizes = [1, 16], strides = [1, 1]} : vector<1x32xf32> to vector<1x16xf32>
    %150 = arith.index_cast %c2_i32 : i32 to index
    %c0_83 = arith.constant 0 : index
    %151 = vector.load %arg12[%150, %c0_83] : memref<8x32xf32, #tpu.memory_space<vmem>>, vector<1x16xf32>
    tpu.vector_store %arg12[%150, %c0_83], %149 {strides = array<i32>} : memref<8x32xf32, #tpu.memory_space<vmem>>, vector<1x16xf32>,
    %152 = vector.extract_strided_slice %148 {offsets = [0, 16], sizes = [1, 16], strides = [1, 1]} : vector<1x32xf32> to vector<1x16xf32>
    %153 = arith.index_cast %128 : i32 to index
    %c16_84 = arith.constant 16 : index
    %154 = vector.load %arg12[%153, %c16_84] : memref<8x32xf32, #tpu.memory_space<vmem>>, vector<1x16xf32>
    tpu.vector_store %arg12[%153, %c16_84], %152 {strides = array<i32>} : memref<8x32xf32, #tpu.memory_space<vmem>>, vector<1x16xf32>,
    %c3_i32 = arith.constant 3 : i32
    %c7_i32_85 = arith.constant 7 : i32
    %155 = arith.subi %c7_i32_85, %c3_i32 : i32
    %156 = arith.index_cast %c3_i32 : i32 to index
    %c0_86 = arith.constant 0 : index
    %157 = vector.load %arg11[%156, %c0_86] : memref<8x128xf32, #tpu.memory_space<vmem>>, vector<1x128xf32>
    %cst_87 = arith.constant dense<0.000000e+00> : vector<1x128xf32>
    %158 = tpu.matmul %148, %71, %cst_87 {dimension_numbers = #tpu.dot_dimension_numbers<[1], [0], [0], [1], [0, 0, 1, 1], [], []>} : vector<1x32xf32>, vector<32x128xf32>, vector<1x128xf32> -> vector<1x128xf32>
    %159 = arith.addf %157, %158 : vector<1x128xf32>
    %160 = vector.extract_strided_slice %159 {offsets = [0, 0], sizes = [1, 96], strides = [1, 1]} : vector<1x128xf32> to vector<1x96xf32>
    %161 = arith.negf %160 : vector<1x96xf32>
    %162 = math.exp %161 : vector<1x96xf32>
    %cst_88 = arith.constant 1.000000e+00 : f32
    %163 = vector.broadcast %cst_88 : f32 to vector<1x96xf32>
    %164 = arith.addf %163, %162 : vector<1x96xf32>
    %165 = arith.divf %163, %164 : vector<1x96xf32>
    %166 = vector.extract_strided_slice %165 {offsets = [0, 0], sizes = [1, 32], strides = [1, 1]} : vector<1x96xf32> to vector<1x32xf32>
    %167 = vector.extract_strided_slice %165 {offsets = [0, 32], sizes = [1, 32], strides = [1, 1]} : vector<1x96xf32> to vector<1x32xf32>
    %168 = vector.extract_strided_slice %165 {offsets = [0, 64], sizes = [1, 32], strides = [1, 1]} : vector<1x96xf32> to vector<1x32xf32>
    %169 = vector.extract_strided_slice %159 {offsets = [0, 96], sizes = [1, 32], strides = [1, 1]} : vector<1x128xf32> to vector<1x32xf32>
    %170 = math.tanh %169 : vector<1x32xf32>
    %171 = arith.mulf %167, %146 : vector<1x32xf32>
    %172 = arith.mulf %166, %170 : vector<1x32xf32>
    %173 = arith.addf %171, %172 : vector<1x32xf32>
    %174 = math.tanh %173 : vector<1x32xf32>
    %175 = arith.mulf %168, %174 : vector<1x32xf32>
    %176 = vector.extract_strided_slice %175 {offsets = [0, 0], sizes = [1, 16], strides = [1, 1]} : vector<1x32xf32> to vector<1x16xf32>
    %177 = arith.index_cast %c3_i32 : i32 to index
    %c0_89 = arith.constant 0 : index
    %178 = vector.load %arg12[%177, %c0_89] : memref<8x32xf32, #tpu.memory_space<vmem>>, vector<1x16xf32>
    tpu.vector_store %arg12[%177, %c0_89], %176 {strides = array<i32>} : memref<8x32xf32, #tpu.memory_space<vmem>>, vector<1x16xf32>,
    %179 = vector.extract_strided_slice %175 {offsets = [0, 16], sizes = [1, 16], strides = [1, 1]} : vector<1x32xf32> to vector<1x16xf32>
    %180 = arith.index_cast %155 : i32 to index
    %c16_90 = arith.constant 16 : index
    %181 = vector.load %arg12[%180, %c16_90] : memref<8x32xf32, #tpu.memory_space<vmem>>, vector<1x16xf32>
    tpu.vector_store %arg12[%180, %c16_90], %179 {strides = array<i32>} : memref<8x32xf32, #tpu.memory_space<vmem>>, vector<1x16xf32>,
    %c4_i32 = arith.constant 4 : i32
    %c7_i32_91 = arith.constant 7 : i32
    %182 = arith.subi %c7_i32_91, %c4_i32 : i32
    %183 = arith.index_cast %c4_i32 : i32 to index
    %c0_92 = arith.constant 0 : index
    %184 = vector.load %arg11[%183, %c0_92] : memref<8x128xf32, #tpu.memory_space<vmem>>, vector<1x128xf32>
    %cst_93 = arith.constant dense<0.000000e+00> : vector<1x128xf32>
    %185 = tpu.matmul %175, %71, %cst_93 {dimension_numbers = #tpu.dot_dimension_numbers<[1], [0], [0], [1], [0, 0, 1, 1], [], []>} : vector<1x32xf32>, vector<32x128xf32>, vector<1x128xf32> -> vector<1x128xf32>
    %186 = arith.addf %184, %185 : vector<1x128xf32>
    %187 = vector.extract_strided_slice %186 {offsets = [0, 0], sizes = [1, 96], strides = [1, 1]} : vector<1x128xf32> to vector<1x96xf32>
    %188 = arith.negf %187 : vector<1x96xf32>
    %189 = math.exp %188 : vector<1x96xf32>
    %cst_94 = arith.constant 1.000000e+00 : f32
    %190 = vector.broadcast %cst_94 : f32 to vector<1x96xf32>
    %191 = arith.addf %190, %189 : vector<1x96xf32>
    %192 = arith.divf %190, %191 : vector<1x96xf32>
    %193 = vector.extract_strided_slice %192 {offsets = [0, 0], sizes = [1, 32], strides = [1, 1]} : vector<1x96xf32> to vector<1x32xf32>
    %194 = vector.extract_strided_slice %192 {offsets = [0, 32], sizes = [1, 32], strides = [1, 1]} : vector<1x96xf32> to vector<1x32xf32>
    %195 = vector.extract_strided_slice %192 {offsets = [0, 64], sizes = [1, 32], strides = [1, 1]} : vector<1x96xf32> to vector<1x32xf32>
    %196 = vector.extract_strided_slice %186 {offsets = [0, 96], sizes = [1, 32], strides = [1, 1]} : vector<1x128xf32> to vector<1x32xf32>
    %197 = math.tanh %196 : vector<1x32xf32>
    %198 = arith.mulf %194, %173 : vector<1x32xf32>
    %199 = arith.mulf %193, %197 : vector<1x32xf32>
    %200 = arith.addf %198, %199 : vector<1x32xf32>
    %201 = math.tanh %200 : vector<1x32xf32>
    %202 = arith.mulf %195, %201 : vector<1x32xf32>
    %203 = vector.extract_strided_slice %202 {offsets = [0, 0], sizes = [1, 16], strides = [1, 1]} : vector<1x32xf32> to vector<1x16xf32>
    %204 = arith.index_cast %c4_i32 : i32 to index
    %c0_95 = arith.constant 0 : index
    %205 = vector.load %arg12[%204, %c0_95] : memref<8x32xf32, #tpu.memory_space<vmem>>, vector<1x16xf32>
    tpu.vector_store %arg12[%204, %c0_95], %203 {strides = array<i32>} : memref<8x32xf32, #tpu.memory_space<vmem>>, vector<1x16xf32>,
    %206 = vector.extract_strided_slice %202 {offsets = [0, 16], sizes = [1, 16], strides = [1, 1]} : vector<1x32xf32> to vector<1x16xf32>
    %207 = arith.index_cast %182 : i32 to index
    %c16_96 = arith.constant 16 : index
    %208 = vector.load %arg12[%207, %c16_96] : memref<8x32xf32, #tpu.memory_space<vmem>>, vector<1x16xf32>
    tpu.vector_store %arg12[%207, %c16_96], %206 {strides = array<i32>} : memref<8x32xf32, #tpu.memory_space<vmem>>, vector<1x16xf32>,
    %c5_i32 = arith.constant 5 : i32
    %c7_i32_97 = arith.constant 7 : i32
    %209 = arith.subi %c7_i32_97, %c5_i32 : i32
    %210 = arith.index_cast %c5_i32 : i32 to index
    %c0_98 = arith.constant 0 : index
    %211 = vector.load %arg11[%210, %c0_98] : memref<8x128xf32, #tpu.memory_space<vmem>>, vector<1x128xf32>
    %cst_99 = arith.constant dense<0.000000e+00> : vector<1x128xf32>
    %212 = tpu.matmul %202, %71, %cst_99 {dimension_numbers = #tpu.dot_dimension_numbers<[1], [0], [0], [1], [0, 0, 1, 1], [], []>} : vector<1x32xf32>, vector<32x128xf32>, vector<1x128xf32> -> vector<1x128xf32>
    %213 = arith.addf %211, %212 : vector<1x128xf32>
    %214 = vector.extract_strided_slice %213 {offsets = [0, 0], sizes = [1, 96], strides = [1, 1]} : vector<1x128xf32> to vector<1x96xf32>
    %215 = arith.negf %214 : vector<1x96xf32>
    %216 = math.exp %215 : vector<1x96xf32>
    %cst_100 = arith.constant 1.000000e+00 : f32
    %217 = vector.broadcast %cst_100 : f32 to vector<1x96xf32>
    %218 = arith.addf %217, %216 : vector<1x96xf32>
    %219 = arith.divf %217, %218 : vector<1x96xf32>
    %220 = vector.extract_strided_slice %219 {offsets = [0, 0], sizes = [1, 32], strides = [1, 1]} : vector<1x96xf32> to vector<1x32xf32>
    %221 = vector.extract_strided_slice %219 {offsets = [0, 32], sizes = [1, 32], strides = [1, 1]} : vector<1x96xf32> to vector<1x32xf32>
    %222 = vector.extract_strided_slice %219 {offsets = [0, 64], sizes = [1, 32], strides = [1, 1]} : vector<1x96xf32> to vector<1x32xf32>
    %223 = vector.extract_strided_slice %213 {offsets = [0, 96], sizes = [1, 32], strides = [1, 1]} : vector<1x128xf32> to vector<1x32xf32>
    %224 = math.tanh %223 : vector<1x32xf32>
    %225 = arith.mulf %221, %200 : vector<1x32xf32>
    %226 = arith.mulf %220, %224 : vector<1x32xf32>
    %227 = arith.addf %225, %226 : vector<1x32xf32>
    %228 = math.tanh %227 : vector<1x32xf32>
    %229 = arith.mulf %222, %228 : vector<1x32xf32>
    %230 = vector.extract_strided_slice %229 {offsets = [0, 0], sizes = [1, 16], strides = [1, 1]} : vector<1x32xf32> to vector<1x16xf32>
    %231 = arith.index_cast %c5_i32 : i32 to index
    %c0_101 = arith.constant 0 : index
    %232 = vector.load %arg12[%231, %c0_101] : memref<8x32xf32, #tpu.memory_space<vmem>>, vector<1x16xf32>
    tpu.vector_store %arg12[%231, %c0_101], %230 {strides = array<i32>} : memref<8x32xf32, #tpu.memory_space<vmem>>, vector<1x16xf32>,
    %233 = vector.extract_strided_slice %229 {offsets = [0, 16], sizes = [1, 16], strides = [1, 1]} : vector<1x32xf32> to vector<1x16xf32>
    %234 = arith.index_cast %209 : i32 to index
    %c16_102 = arith.constant 16 : index
    %235 = vector.load %arg12[%234, %c16_102] : memref<8x32xf32, #tpu.memory_space<vmem>>, vector<1x16xf32>
    tpu.vector_store %arg12[%234, %c16_102], %233 {strides = array<i32>} : memref<8x32xf32, #tpu.memory_space<vmem>>, vector<1x16xf32>,
    %c6_i32 = arith.constant 6 : i32
    %c7_i32_103 = arith.constant 7 : i32
    %236 = arith.subi %c7_i32_103, %c6_i32 : i32
    %237 = arith.index_cast %c6_i32 : i32 to index
    %c0_104 = arith.constant 0 : index
    %238 = vector.load %arg11[%237, %c0_104] : memref<8x128xf32, #tpu.memory_space<vmem>>, vector<1x128xf32>
    %cst_105 = arith.constant dense<0.000000e+00> : vector<1x128xf32>
    %239 = tpu.matmul %229, %71, %cst_105 {dimension_numbers = #tpu.dot_dimension_numbers<[1], [0], [0], [1], [0, 0, 1, 1], [], []>} : vector<1x32xf32>, vector<32x128xf32>, vector<1x128xf32> -> vector<1x128xf32>
    %240 = arith.addf %238, %239 : vector<1x128xf32>
    %241 = vector.extract_strided_slice %240 {offsets = [0, 0], sizes = [1, 96], strides = [1, 1]} : vector<1x128xf32> to vector<1x96xf32>
    %242 = arith.negf %241 : vector<1x96xf32>
    %243 = math.exp %242 : vector<1x96xf32>
    %cst_106 = arith.constant 1.000000e+00 : f32
    %244 = vector.broadcast %cst_106 : f32 to vector<1x96xf32>
    %245 = arith.addf %244, %243 : vector<1x96xf32>
    %246 = arith.divf %244, %245 : vector<1x96xf32>
    %247 = vector.extract_strided_slice %246 {offsets = [0, 0], sizes = [1, 32], strides = [1, 1]} : vector<1x96xf32> to vector<1x32xf32>
    %248 = vector.extract_strided_slice %246 {offsets = [0, 32], sizes = [1, 32], strides = [1, 1]} : vector<1x96xf32> to vector<1x32xf32>
    %249 = vector.extract_strided_slice %246 {offsets = [0, 64], sizes = [1, 32], strides = [1, 1]} : vector<1x96xf32> to vector<1x32xf32>
    %250 = vector.extract_strided_slice %240 {offsets = [0, 96], sizes = [1, 32], strides = [1, 1]} : vector<1x128xf32> to vector<1x32xf32>
    %251 = math.tanh %250 : vector<1x32xf32>
    %252 = arith.mulf %248, %227 : vector<1x32xf32>
    %253 = arith.mulf %247, %251 : vector<1x32xf32>
    %254 = arith.addf %252, %253 : vector<1x32xf32>
    %255 = math.tanh %254 : vector<1x32xf32>
    %256 = arith.mulf %249, %255 : vector<1x32xf32>
    %257 = vector.extract_strided_slice %256 {offsets = [0, 0], sizes = [1, 16], strides = [1, 1]} : vector<1x32xf32> to vector<1x16xf32>
    %258 = arith.index_cast %c6_i32 : i32 to index
    %c0_107 = arith.constant 0 : index
    %259 = vector.load %arg12[%258, %c0_107] : memref<8x32xf32, #tpu.memory_space<vmem>>, vector<1x16xf32>
    tpu.vector_store %arg12[%258, %c0_107], %257 {strides = array<i32>} : memref<8x32xf32, #tpu.memory_space<vmem>>, vector<1x16xf32>,
    %260 = vector.extract_strided_slice %256 {offsets = [0, 16], sizes = [1, 16], strides = [1, 1]} : vector<1x32xf32> to vector<1x16xf32>
    %261 = arith.index_cast %236 : i32 to index
    %c16_108 = arith.constant 16 : index
    %262 = vector.load %arg12[%261, %c16_108] : memref<8x32xf32, #tpu.memory_space<vmem>>, vector<1x16xf32>
    tpu.vector_store %arg12[%261, %c16_108], %260 {strides = array<i32>} : memref<8x32xf32, #tpu.memory_space<vmem>>, vector<1x16xf32>,
    %c7_i32_109 = arith.constant 7 : i32
    %c7_i32_110 = arith.constant 7 : i32
    %263 = arith.subi %c7_i32_110, %c7_i32_109 : i32
    %264 = arith.index_cast %c7_i32_109 : i32 to index
    %c0_111 = arith.constant 0 : index
    %265 = vector.load %arg11[%264, %c0_111] : memref<8x128xf32, #tpu.memory_space<vmem>>, vector<1x128xf32>
    %cst_112 = arith.constant dense<0.000000e+00> : vector<1x128xf32>
    %266 = tpu.matmul %256, %71, %cst_112 {dimension_numbers = #tpu.dot_dimension_numbers<[1], [0], [0], [1], [0, 0, 1, 1], [], []>} : vector<1x32xf32>, vector<32x128xf32>, vector<1x128xf32> -> vector<1x128xf32>
    %267 = arith.addf %265, %266 : vector<1x128xf32>
    %268 = vector.extract_strided_slice %267 {offsets = [0, 0], sizes = [1, 96], strides = [1, 1]} : vector<1x128xf32> to vector<1x96xf32>
    %269 = arith.negf %268 : vector<1x96xf32>
    %270 = math.exp %269 : vector<1x96xf32>
    %cst_113 = arith.constant 1.000000e+00 : f32
    %271 = vector.broadcast %cst_113 : f32 to vector<1x96xf32>
    %272 = arith.addf %271, %270 : vector<1x96xf32>
    %273 = arith.divf %271, %272 : vector<1x96xf32>
    %274 = vector.extract_strided_slice %273 {offsets = [0, 0], sizes = [1, 32], strides = [1, 1]} : vector<1x96xf32> to vector<1x32xf32>
    %275 = vector.extract_strided_slice %273 {offsets = [0, 32], sizes = [1, 32], strides = [1, 1]} : vector<1x96xf32> to vector<1x32xf32>
    %276 = vector.extract_strided_slice %273 {offsets = [0, 64], sizes = [1, 32], strides = [1, 1]} : vector<1x96xf32> to vector<1x32xf32>
    %277 = vector.extract_strided_slice %267 {offsets = [0, 96], sizes = [1, 32], strides = [1, 1]} : vector<1x128xf32> to vector<1x32xf32>
    %278 = math.tanh %277 : vector<1x32xf32>
    %279 = arith.mulf %275, %254 : vector<1x32xf32>
    %280 = arith.mulf %274, %278 : vector<1x32xf32>
    %281 = arith.addf %279, %280 : vector<1x32xf32>
    %282 = math.tanh %281 : vector<1x32xf32>
    %283 = arith.mulf %276, %282 : vector<1x32xf32>
    %284 = vector.extract_strided_slice %283 {offsets = [0, 0], sizes = [1, 16], strides = [1, 1]} : vector<1x32xf32> to vector<1x16xf32>
    %285 = arith.index_cast %c7_i32_109 : i32 to index
    %c0_114 = arith.constant 0 : index
    %286 = vector.load %arg12[%285, %c0_114] : memref<8x32xf32, #tpu.memory_space<vmem>>, vector<1x16xf32>
    tpu.vector_store %arg12[%285, %c0_114], %284 {strides = array<i32>} : memref<8x32xf32, #tpu.memory_space<vmem>>, vector<1x16xf32>,
    %287 = vector.extract_strided_slice %283 {offsets = [0, 16], sizes = [1, 16], strides = [1, 1]} : vector<1x32xf32> to vector<1x16xf32>
    %288 = arith.index_cast %263 : i32 to index
    %c16_115 = arith.constant 16 : index
    %289 = vector.load %arg12[%288, %c16_115] : memref<8x32xf32, #tpu.memory_space<vmem>>, vector<1x16xf32>
    tpu.vector_store %arg12[%288, %c16_115], %287 {strides = array<i32>} : memref<8x32xf32, #tpu.memory_space<vmem>>, vector<1x16xf32>,
    %c8_i32 = arith.constant 8 : i32
    %c0_116 = arith.constant 0 : index
    %c0_117 = arith.constant 0 : index
    %290 = vector.load %arg12[%c0_116, %c0_117] : memref<8x32xf32, #tpu.memory_space<vmem>>, vector<8x32xf32>
    %c0_118 = arith.constant 0 : index
    %c0_119 = arith.constant 0 : index
    %291 = vector.load %arg7[%c0_118, %c0_119] : memref<32x128xf32, #tpu.memory_space<vmem>>, vector<32x128xf32>
    %cst_120 = arith.constant dense<0.000000e+00> : vector<8x128xf32>
    %292 = tpu.matmul %290, %291, %cst_120 {dimension_numbers = #tpu.dot_dimension_numbers<[1], [0], [0], [1], [0, 0, 1, 1], [], []>} : vector<8x32xf32>, vector<32x128xf32>, vector<8x128xf32> -> vector<8x128xf32>
    %c0_121 = arith.constant 0 : index
    %c0_122 = arith.constant 0 : index
    %293 = vector.load %arg8[%c0_121, %c0_122] : memref<1x128xf32, #tpu.memory_space<vmem>>, vector<1x128xf32>
    %294 = vector.broadcast %293 : vector<1x128xf32> to vector<8x128xf32>
    %295 = arith.addf %292, %294 : vector<8x128xf32>
    %c0_123 = arith.constant 0 : index
    %c0_124 = arith.constant 0 : index
    %296 = vector.load %arg9[%c0_123, %c0_124] : memref<8x128xf32, #tpu.memory_space<vmem>>, vector<8x128xf32>
    tpu.vector_store %arg9[%c0_123, %c0_124], %295 {strides = array<i32>} : memref<8x128xf32, #tpu.memory_space<vmem>>, vector<8x128xf32>,
    return
  }
}

</mosaic_0001>

<bundles_post_ra>
// kernel: tpu_custom_call.1
= control target key start
LH: loop header
LB: loop body
LE: loop exit
PB: predicated region body
PF: predicated region fallthrough
CT: control target
= control target key end

     0   :  { %14 = vsyncpa [#allocation8], 0  ;;  %s2066_s0 = inlined_call_operand.hbm [shape: s32[8], index: 0, kind: input, shape index: {}]   ;;  %s2067_s1 = inlined_call_operand.hbm [shape: f32[20,32], index: 1, kind: input, shape index: {}]   ;;  %s2068_s2 = inlined_call_operand.hbm [shape: f32[64,128], index: 2, kind: input, shape index: {}]   ;;  %s2069_s3 = inlined_call_operand.hbm [shape: f32[32,128], index: 3, kind: input, shape index: {}]   ;;  %s2070_s4 = inlined_call_operand.vmem [shape: f32[1,128], index: 4, kind: input, shape index: {}]   ;;  %s2071_s5 = inlined_call_operand.vmem [shape: f32[1,32], index: 5, kind: input, shape index: {}]   ;;  %s2072_s6 = inlined_call_operand.vmem [shape: f32[1,32], index: 6, kind: input, shape index: {}]   ;;  %s2073_s7 = inlined_call_operand.hbm [shape: f32[32,128], index: 7, kind: input, shape index: {}]   ;;  %s2074_s8 = inlined_call_operand.vmem [shape: f32[1,128], index: 8, kind: input, shape index: {}]   ;;  %s2075_s9 = inlined_call_operand.hbm [shape: f32[8,128], index: 9, kind: output, shape index: {}]  }
   0x1   :  { %15 = vsyncpa [#allocation6], 0 }
   0x2   :  { %16 = vsyncpa [#allocation11], 0 }
   0x3   :  { %17 = vsyncpa [#allocation14], 0 }
   0x4   :  { %18 = vsyncpa [#allocation7], 0  ;;  %s1738_s30 = smov [#allocation10]   ;;  %s1739_s11 = smov [#allocation9]  }
   0x5   :  { %s44_s10 = sshll.u32 %s1738_s30, 4  ;;  %s32_s12 = sshll.u32 %s1739_s11, 4  ;;  %s45_s10 = int_to_ptr.vmem [resolvable:$true] %s44_s10  ;;  %s33_s12 = int_to_ptr.vmem [resolvable:$true] %s32_s12 }
   0x6   :  { %s1608_s15 = scalar_lea.hbm %s2068_s2, 1024 }
   0x7   :  { %p1609_p0 = scmp.ne.s32.totalorder %s2068_s2, %s1608_s15  ;;  %p1612_p1 = scmp.lt.u32.totalorder %s1608_s15, %s2068_s2 }
   0x9   :  { %p1614_p2 = pnand %p1612_p1, %p1609_p0 }
   0xb   :  { %1617 = shalt.err (!%p1614_p2)
}
   0xc   :  { %s1618_s20 = scalar_lea.vmem %s45_s10, 1024  ;;  %p1623_p4 = scmp.lt.s32.totalorder %s45_s10, %s45_s10 }
   0xd   :  { %p1619_p3 = scmp.ne.s32.totalorder %s45_s10, %s1618_s20  ;;  %p1624_p5 = scmp.lt.s32.totalorder %s1618_s20, %s1618_s20 }
   0xf   :  { %p1625_p6 = por %p1624_p5, %p1623_p4 }
  0x11   :  { %p1626_p7 = pnand %p1625_p6, %p1619_p3 }
  0x13   :  { %1629 = shalt.err (!%p1626_p7)
}
  0x14   :  { %s1740_s21 = smov 128   ;;  %s1741_s22 = smov 8  }
  0x15   :  { %50 = dma.hbm_to_vmem [thread:$0]  %s2068_s2, 1024, %s45_s10, [#allocation11], %s1740_s21, %s1740_s21, %s1741_s22  }
  0x16   :  { %s1630_s27 = scalar_lea.hbm %s2066_s0, 16 }
  0x17   :  { %p1631_p8 = scmp.ne.s32.totalorder %s2066_s0, %s1630_s27  ;;  %p1634_p9 = scmp.lt.u32.totalorder %s1630_s27, %s2066_s0 }
  0x19   :  { %p1636_p10 = pnand %p1634_p9, %p1631_p8 }
  0x1b   :  { %1639 = shalt.err (!%p1636_p10)
}
  0x1c   :  { %s1742_s13 = smov [#allocation5]   ;;  %s1640_s16 = scalar_lea.hbm %s2067_s1, 384 }
  0x1d   :  { %26 = dma.hbm_to_smem %s2066_s0, 16, %s1742_s13, [#allocation8]  }
  0x1e   :  { %p1641_p11 = scmp.ne.s32.totalorder %s2067_s1, %s1640_s16  ;;  %p1644_p12 = scmp.lt.u32.totalorder %s1640_s16, %s2067_s1 }
  0x20   :  { %p1646_p13 = pnand %p1644_p12, %p1641_p11 }
  0x22   :  { %1649 = shalt.err (!%p1646_p13)
}
  0x23   :  { %s1650_s23 = scalar_lea.vmem %s33_s12, 384  ;;  %p1655_p1 = scmp.lt.s32.totalorder %s33_s12, %s33_s12 }
  0x24   :  { %p1651_p0 = scmp.ne.s32.totalorder %s33_s12, %s1650_s23  ;;  %p1656_p2 = scmp.lt.s32.totalorder %s1650_s23, %s1650_s23 }
  0x26   :  { %p1657_p3 = por %p1656_p2, %p1655_p1 }
  0x28   :  { %p1658_p4 = pnand %p1657_p3, %p1651_p0 }
  0x2a   :  { %1661 = shalt.err (!%p1658_p4)
}
  0x2b   :  { %38 = dma.hbm_to_vmem [thread:$0]  %s2067_s1, 384, %s33_s12, [#allocation6], %s1740_s21, %s1740_s21, %s1741_s22  }
  0x2c   :  { %s1743_s25 = smov [#allocation12]   ;;  %s1744_s27 = smov [#allocation13]  }
  0x2d   :  { %s56_s26 = sshll.u32 %s1743_s25, 4  ;;  %s74_s28 = sshll.u32 %s1744_s27, 4  ;;  %s57_s26 = int_to_ptr.vmem [resolvable:$true] %s56_s26  ;;  %s75_s28 = int_to_ptr.vmem [resolvable:$true] %s74_s28 }
  0x2e   :  { %s1662_s11 = scalar_lea.hbm %s2069_s3, 512 }
  0x2f   :  { %p1663_p5 = scmp.ne.s32.totalorder %s2069_s3, %s1662_s11  ;;  %p1666_p6 = scmp.lt.u32.totalorder %s1662_s11, %s2069_s3 }
  0x31   :  { %p1668_p7 = pnand %p1666_p6, %p1663_p5 }
  0x33   :  { %1671 = shalt.err (!%p1668_p7)
}
  0x34   :  { %s1672_s1 = scalar_lea.vmem %s57_s26, 512  ;;  %p1677_p9 = scmp.lt.s32.totalorder %s57_s26, %s57_s26 }
  0x35   :  { %p1673_p8 = scmp.ne.s32.totalorder %s57_s26, %s1672_s1  ;;  %p1678_p10 = scmp.lt.s32.totalorder %s1672_s1, %s1672_s1 }
  0x37   :  { %p1679_p11 = por %p1678_p10, %p1677_p9 }
  0x39   :  { %p1680_p12 = pnand %p1679_p11, %p1673_p8 }
  0x3b   :  { %1683 = shalt.err (!%p1680_p12)
}
  0x3c   :  { %62 = dma.hbm_to_vmem [thread:$0]  %s2069_s3, 512, %s57_s26, [#allocation11], %s1740_s21, %s1740_s21, %s1741_s22  }
  0x3d   :  { %s1684_s18 = scalar_lea.hbm %s2073_s7, 512 }
  0x3e   :  { %p1685_p13 = scmp.ne.s32.totalorder %s2073_s7, %s1684_s18  ;;  %p1688_p0 = scmp.lt.u32.totalorder %s1684_s18, %s2073_s7 }
  0x40   :  { %p1690_p1 = pnand %p1688_p0, %p1685_p13 }
  0x42   :  { %1693 = shalt.err (!%p1690_p1)
}
  0x43   :  { %s1694_s24 = scalar_lea.vmem %s75_s28, 512  ;;  %p1699_p3 = scmp.lt.s32.totalorder %s75_s28, %s75_s28 }
  0x44   :  { %p1695_p2 = scmp.ne.s32.totalorder %s75_s28, %s1694_s24  ;;  %p1700_p4 = scmp.lt.s32.totalorder %s1694_s24, %s1694_s24 }
  0x46   :  { %p1701_p5 = por %p1700_p4, %p1699_p3 }
  0x48   :  { %p1702_p6 = pnand %p1701_p5, %p1695_p2 }
  0x4a   :  { %1705 = shalt.err (!%p1702_p6)
}
  0x4b   :  { %80 = dma.hbm_to_vmem [thread:$0]  %s2073_s7, 512, %s75_s28, [#allocation14], %s1740_s21, %s1740_s21, %s1741_s22  }
  0x4c   :  { %1728 = dma.done.wait [#allocation8], 16  }
  0x4d   :  { %1729 = vsyncadd [#allocation8], 4294967280 }
  0x4e   :  { %1730 = dma.done.wait [#allocation6], 384  }
  0x4f   :  { %1731 = vsyncadd [#allocation6], 4294966912 }
  0x50   :  { %1732 = dma.done.wait [#allocation11], 1536  }
  0x51   :  { %1733 = vsyncadd [#allocation11], 4294965760 }
  0x52   :  { %1734 = dma.done.wait [#allocation14], 512  }
  0x53   :  { %1735 = vsyncadd [#allocation14], 4294966784 }
  0x54   :  { %98 = sfence }
  0x55   :  { %s1262_s26 = sld [smem:[#allocation5 + $0x5]]  ;;  %s1873_s27 = sld [smem:[#allocation5 + $0x7]]  ;;  %v1745_v0 = vmov 0.0|0.0   ;;  %v198_v1 = vld [vmem:[#allocation10] sm:$0xff]  ;;  %v199_v2 = vld [vmem:[#allocation10 + $0x8] sm:$0xff]  ;;  %v200_v4 = vld [vmem:[#allocation10 + $0x10] sm:$0xff] }
  0x56   :  { %s1875_s29 = sld [smem:[#allocation5 + $0x4]]  ;;  %1465 = vmatprep.subr.bf16.mxu0 %v1745_v0  ;;  %1477 = vmatprep.subr.bf16.mxu1 %v1745_v0  ;;  %s1879_s7 = sld [smem:[#allocation5 + $0x6]]  ;;  %v1466_v3 = vpack.c.bf16 %v199_v2, %v198_v1  ;;  %v201_v5 = vld [vmem:[#allocation10 + $0x18] sm:$0xff]  ;;  %vm102_vm0 = vcmask 253952   ;;  %v202_v7 = vld [vmem:[#allocation10 + $0x20] sm:$0xff]  ;;  %v203_v8 = vld [vmem:[#allocation10 + $0x28] sm:$0xff] }
  0x57   :  { %s1881_s21 = sld [smem:[#allocation5 + $0x2]]  ;;  %s1883_s22 = sld [smem:[#allocation5 + $0x3]]  ;;  %v1469_v6 = vpack.c.bf16 %v201_v5, %v200_v4  ;;  %v1472_v12 = vpack.c.bf16 %v203_v8, %v202_v7  ;;  %v204_v18 = vld [vmem:[#allocation10 + $0x30] sm:$0xff]  ;;  %v205_v24 = vld [vmem:[#allocation10 + $0x38] sm:$0xff]  ;;  %vm1747_vm1 = vmmov 0   ;;  %v1748_v27 = vmov 0.0  }
  0x58   :  { %s1885_s28 = sld [smem:[#allocation5]]  ;;  %s1887_s30 = sld [smem:[#allocation5 + $0x1]]  ;;  %1467 = vmatpush3.bf16.msra.mxu0 %v1466_v3  ;;  %v1475_v26 = vpack.c.bf16 %v205_v24, %v204_v18  ;;  %1363 = vmatprep.mubr.msk.f32.mxu0 %vm1747_vm1, %v1748_v27  ;;  %v288_v28 = vld [vmem:[#allocation12] sm:$0xff]  ;;  %v289_v29 = vld [vmem:[#allocation12 + $0x8] sm:$0xff]  ;;  %v290_v31 = vld [vmem:[#allocation12 + $0x10] sm:$0xff]  ;;  %vm295_vm2 = vcmask 261120  }
  0x59   :  { %1468 = vmatprep.subr.bf16.mxu0 %v1745_v0  ;;  %s1746_s13 = smov 32   ;;  %1374 = vmatprep.mubr.msk.f32.mxu1 %vm1747_vm1, %v1748_v27  ;;  %v1918_v30 = vpack.c.bf16 %v289_v29, %v288_v28  ;;  %v291_v32 = vld [vmem:[#allocation12 + $0x18] sm:$0xff]  ;;  %v1276_v36 = vld [vmem:[%s2072_s6] ss:$0 sm:$0xff]  ;;  %vm111_vm3 = vcmask 516352   ;;  %vm213_vm4 = vcmask 523264  }
  0x5a   :  { %v1925_v35 = vpack.c.bf16 %v291_v32, %v290_v31  ;;  %v292_v37 = vld [vmem:[%s2071_s5] sm:$0x1]  ;;  %vm406_vm5 = vcmask 122880   ;;  %vm408_vm6 = vcmask 254080   ;;  %s1750_s24 = smov [#allocation15]  }
  0x5b   :  { %s130_s11 = scalar_lea.vmem [#allocation9], %s1262_s26  ;;  %s105_s14 = scalar_lea.vmem [#allocation9], %s1873_s27  ;;  %1479 = vmatpush3.bf16.msra.mxu1 %v1918_v30  ;;  %v1272_v49 = vld [vmem:[%s2070_s4] ss:$0 sm:$0xff] }
  0x5c   :  { %v131_v9 = vld [vmem:[%s130_s11] sm:$0x1]  ;;  %1470 = vmatpush3.bf16.msra.mxu0 %v1469_v6  ;;  %s142_s15 = scalar_lea.vmem [#allocation9], %s1875_s29  ;;  %s118_s2 = scalar_lea.vmem [#allocation9], %s1879_s7  ;;  %1480 = vmatprep.subr.bf16.mxu1 %v1745_v0 }
  0x5d   :  { %v163_v10 = vld [vmem:[%s130_s11] sm:$0x1]  ;;  %133 = vrot.lane.b32.xlu1 %v131_v9, %s1746_s13  ;;  %1471 = vmatprep.subr.bf16.mxu0 %v1745_v0  ;;  %s166_s1 = scalar_lea.vmem [#allocation9], %s1881_s21  ;;  %s154_s10 = scalar_lea.vmem [#allocation9], %s1883_s22 }
  0x5e   :  { %v106_v11 = vld [vmem:[%s105_s14] sm:$0x1]  ;;  %164 = vst.msk [vmem:[#allocation2 + $0x5] sm:$0x1] %vm102_vm0, %v163_v10  ;;  %s190_s12 = scalar_lea.vmem [#allocation9], %s1885_s28  ;;  %s178_s16 = scalar_lea.vmem [#allocation9], %s1887_s30 }
  0x5f   :  { %108 = vrot.lane.b32.xlu0 %v106_v11, %s1746_s13  ;;  %v143_v13 = vld [vmem:[%s142_s15] sm:$0x1]  ;;  %1482 = vmatpush3.bf16.msra.mxu1 %v1925_v35  ;;  %s1749_s4 = smov 64   ;;  %s1230_s3 = sshll.u32 %s1750_s24, 4  ;;  %s1231_s3 = int_to_ptr.vmem [resolvable:$true] %s1230_s3 }
  0x60   :  { %v119_v14 = vld [vmem:[%s118_s2] sm:$0x1]  ;;  %1473 = vmatpush3.bf16.msra.mxu0 %v1472_v12  ;;  %1483 = vmatprep.subr.bf16.mxu1 %v1745_v0  ;;  %s1706_s25 = scalar_lea.vmem %s1231_s3, 128  ;;  %p1711_p8 = scmp.lt.s32.totalorder %s1231_s3, %s1231_s3 }
  0x61   :  { %v167_v15 = vld [vmem:[%s166_s1] sm:$0x1]  ;;  %145 = vrot.lane.b32.xlu1 %v143_v13, %s1746_s13  ;;  %1474 = vmatprep.subr.bf16.mxu0 %v1745_v0  ;;  %p1707_p7 = scmp.ne.s32.totalorder %s1231_s3, %s1706_s25  ;;  %p1712_p9 = scmp.lt.s32.totalorder %s1706_s25, %s1706_s25 }
  0x62   :  { %v127_v16 = vld [vmem:[%s166_s1] sm:$0x1]  ;;  %1375 = vmatmul.mubr.msk.f32.vlgmr.msra.gmra.mrb[0].mxu1 %vm295_vm2, %v292_v37 }
  0x63   :  { %v101_v17 = vld [vmem:[%s190_s12] sm:$0x1]  ;;  %128 = vst.msk [vmem:[#allocation2 + $0x2] sm:$0x1] %vm102_vm0, %v127_v16  ;;  %121 = vrot.lane.b32.xlu0 %v119_v14, %s1746_s13  ;;  %1485 = vmatpush3.bf16.msra.mxu1 %v1918_v30  ;;  %p1713_p10 = por %p1712_p9, %p1711_p8 }
  0x64   :  { %103 = vst.msk [vmem:[#allocation2] sm:$0x1] %vm102_vm0, %v101_v17  ;;  %v139_v19 = vld [vmem:[%s154_s10] sm:$0x1]  ;;  %1476 = vmatpush3.bf16.msra.mxu0 %v1475_v26  ;;  %1385 = vmatprep.mubr.msk.f32.mxu1 %vm1747_vm1, %v1748_v27 }
  0x65   :  { %v115_v20 = vld [vmem:[%s178_s16] sm:$0x1]  ;;  %140 = vst.msk [vmem:[#allocation2 + $0x3] sm:$0x1] %vm102_vm0, %v139_v19  ;;  %169 = vrot.lane.b32.xlu1 %v167_v15, %s1746_s13  ;;  %1489 = vmatprep.subr.bf16.mxu0 %v1745_v0  ;;  %p1714_p11 = pnand %p1713_p10, %p1707_p7 }
  0x66   :  { %v151_v21 = vld [vmem:[%s142_s15] sm:$0x1]  ;;  %116 = vst.msk [vmem:[#allocation2 + $0x1] sm:$0x1] %vm102_vm0, %v115_v20  ;;  %1486 = vmatprep.subr.bf16.mxu1 %v1745_v0 }
  0x67   :  { %152 = vst.msk [vmem:[#allocation2 + $0x4] sm:$0x1] %vm102_vm0, %v151_v21  ;;  %v187_v22 = vld [vmem:[%s105_s14] sm:$0x1]  ;;  %1488 = vmatpush3.bf16.msra.mxu1 %v1925_v35 }
  0x68   :  { %v175_v23 = vld [vmem:[%s118_s2] sm:$0x1]  ;;  %188 = vst.msk [vmem:[#allocation2 + $0x7] sm:$0x1] %vm102_vm0, %v187_v22  ;;  %1495 = vmatprep.subr.bf16.mxu1 %v1745_v0 }
  0x69   :  { %v155_v25 = vld [vmem:[%s154_s10] sm:$0x1]  ;;  %176 = vst.msk [vmem:[#allocation2 + $0x6] sm:$0x1] %vm102_vm0, %v175_v23 }
  0x6a   :  { %157 = vrot.lane.b32.xlu0 %v155_v25, %s1746_s13  ;;  %v191_v33 = vld [vmem:[%s190_s12] sm:$0x1] }
  0x6b   :  { %v179_v34 = vld [vmem:[%s178_s16] sm:$0x1]  ;;  %193 = vrot.lane.b32.xlu1 %v191_v33, %s1746_s13 }
  0x6e   :  { %181 = vrot.lane.b32.xlu0 %v179_v34, %s1746_s13 }
  0x6f   :  { %382 = vrot.lane.b32.xlu1 %v1276_v36, %s1746_s13 }
  0xcf   :  { %v134_v38 = vpop.permute.xlu1 %133 }
  0xd0   :  { %136 = vst.msk [vmem:[#allocation2 + $0x2] sm:$0x1] %vm111_vm3, %v134_v38 }
  0xd1   :  { %v109_v39 = vpop.permute.xlu0 %108 }
  0xd2   :  { %112 = vst.msk [vmem:[#allocation2] sm:$0x1] %vm111_vm3, %v109_v39 }
  0xd3   :  { %v146_v40 = vpop.permute.xlu1 %145 }
  0xd4   :  { %148 = vst.msk [vmem:[#allocation2 + $0x3] sm:$0x1] %vm111_vm3, %v146_v40 }
  0xd5   :  { %v122_v41 = vpop.permute.xlu0 %121 }
  0xd6   :  { %124 = vst.msk [vmem:[#allocation2 + $0x1] sm:$0x1] %vm111_vm3, %v122_v41 }
  0xd7   :  { %v170_v42 = vpop.permute.xlu1 %169 }
  0xd8   :  { %172 = vst.msk [vmem:[#allocation2 + $0x5] sm:$0x1] %vm111_vm3, %v170_v42 }
  0xdc   :  { %v158_v43 = vpop.permute.xlu0 %157 }
  0xdd   :  { %160 = vst.msk [vmem:[#allocation2 + $0x4] sm:$0x1] %vm111_vm3, %v158_v43  ;;  %v194_v44 = vpop.permute.xlu1 %193 }
  0xde   :  { %196 = vst.msk [vmem:[#allocation2 + $0x7] sm:$0x1] %vm111_vm3, %v194_v44 }
  0xe0   :  { %v182_v45 = vpop.permute.xlu0 %181 }
  0xe1   :  { %184 = vst.msk [vmem:[#allocation2 + $0x6] sm:$0x1] %vm111_vm3, %v182_v45  ;;  %v383_v62 = vpop.permute.xlu1 %382 }
  0xe8   :  { %v197_v46 = vld [vmem:[#allocation2] sm:$0xff] }
  0xe9   :  { %1364 = vmatmul.mubr.msk.f32.vlgmr.msra.gmra.mrb[0].mxu0 %vm213_vm4, %v197_v46 }
  0xea   :  { %1491 = vmatpush3.bf16.msra.mxu0 %v1918_v30  ;;  %1396 = vmatprep.mubr.msk.f32.mxu0 %vm1747_vm1, %v1748_v27 }
  0xeb   :  { %1492 = vmatprep.subr.bf16.mxu0 %v1745_v0 }
  0xee   :  { %1494 = vmatpush3.bf16.msra.mxu0 %v1925_v35 }
  0xef   :  { %1501 = vmatprep.subr.bf16.mxu0 %v1745_v0 }
 0x135   :  { %v365_v47 = vpop.f32.mrb[0].mxu1 }
 0x136   :  { %v1376_v48 = vpop.f32.mrb[1].mxu1 }
 0x1bc   :  { %v283_v50 = vpop.f32.mrb[0].mxu0 }
 0x1bd   :  { %v284_v51 = vadd.f32 %v1272_v49, %v283_v50  ;;  %v1365_v52 = vpop.f32.mrb[1].mxu0 }
 0x1bf   :  { %287 = vst [vmem:[#allocation3] sm:$0xff] %v284_v51 }
 0x1c6   :  { %v294_v53 = vld [vmem:[#allocation3] sm:$0x1]  ;;  %v410_v7 = vld [vmem:[#allocation3 + $0x1] sm:$0x1]  ;;  %v514_v25 = vld [vmem:[#allocation3 + $0x2] sm:$0x1] }
 0x1c7   :  { %v369_v54 = vadd.f32 %v365_v47, %v294_v53  ;;  %v618_v46 = vld [vmem:[#allocation3 + $0x3] sm:$0x1] }
 0x1c9   :  { %1544 = vtanh.f32 %v369_v54  ;;  %v1275_v56 = vmul.f32 -1.442695, %v369_v54 }
 0x1cb   :  { %1546 = vpow2.f32 %v1275_v56 }
 0x1d3   :  { %v1545_v55 = vpop.eup %1544 }
 0x1d4   :  { %387 = vrot.lane.b32.xlu0 %v1545_v55, %s1746_s13 }
 0x1d5   :  { %v1547_v57 = vpop.eup %1546 }
 0x1d6   :  { %v373_v58 = vadd.f32 1.0, %v1547_v57 }
 0x1d8   :  { %1548 = vrcp.f32 %v373_v58 }
 0x1e2   :  { %v1549_v59 = vpop.eup %1548 }
 0x1e3   :  { %v385_v63 = vmul.f32 %v1549_v59, %v383_v62 }
 0x246   :  { %v388_v60 = vpop.permute.xlu0 %387 }
 0x247   :  { %v390_v61 = vmul.f32 %v1549_v59, %v388_v60 }
 0x249   :  { %392 = vrot.lane.b32.xlu0 %v390_v61, %s1746_s13 }
 0x2bb   :  { %v393_v1 = vpop.permute.xlu0 %392 }
 0x2bc   :  { %v395_v2 = vadd.f32 %v393_v1, %v385_v63  ;;  %v722_v1 = vld [vmem:[#allocation3 + $0x4] sm:$0x1] }
 0x2be   :  { %1550 = vtanh.f32 %v395_v2 }
 0x2c8   :  { %v1551_v3 = vpop.eup %1550 }
 0x2c9   :  { %398 = vrot.lane.b32.xlu1 %v1551_v3, %s1746_s13 }
 0x33b   :  { %v399_v4 = vpop.permute.xlu1 %398 }
 0x33c   :  { %v401_v5 = vmul.f32 %v1549_v59, %v399_v4 }
 0x33e   :  { %403 = vrot.lane.b32.xlu0 %v401_v5, %s1749_s4 }
 0x3b0   :  { %v404_v6 = vpop.permute.xlu0 %403 }
 0x3b1   :  { %407 = vst.msk [vmem:[#allocation4] sm:$0x1] %vm406_vm5, %v404_v6  ;;  %1386 = vmatmul.mubr.msk.f32.vlgmr.msra.gmra.mrb[2].mxu1 %vm295_vm2, %v404_v6 }
 0x3b2   :  { %409 = vst.msk [vmem:[#allocation4 + $0x7] sm:$0x1] %vm408_vm6, %v404_v6  ;;  %1497 = vmatpush3.bf16.msra.mxu1 %v1918_v30  ;;  %1407 = vmatprep.mubr.msk.f32.mxu1 %vm1747_vm1, %v1748_v27 }
 0x3b3   :  { %1498 = vmatprep.subr.bf16.mxu1 %v1745_v0 }
 0x3b6   :  { %1500 = vmatpush3.bf16.msra.mxu1 %v1925_v35 }
 0x3b7   :  { %1507 = vmatprep.subr.bf16.mxu1 %v1745_v0 }
 0x484   :  { %v479_v8 = vpop.f32.mrb[2].mxu1 }
 0x485   :  { %v483_v9 = vadd.f32 %v479_v8, %v410_v7  ;;  %v1387_v10 = vpop.f32.mrb[3].mxu1 }
 0x487   :  { %1552 = vtanh.f32 %v483_v9  ;;  %v1278_v12 = vmul.f32 -1.442695, %v483_v9 }
 0x489   :  { %1554 = vpow2.f32 %v1278_v12 }
 0x491   :  { %v1553_v11 = vpop.eup %1552 }
 0x492   :  { %493 = vrot.lane.b32.xlu1 %v1553_v11, %s1746_s13 }
 0x493   :  { %v1555_v13 = vpop.eup %1554 }
 0x494   :  { %v487_v14 = vadd.f32 1.0, %v1555_v13 }
 0x496   :  { %1556 = vrcp.f32 %v487_v14 }
 0x4a0   :  { %v1557_v15 = vpop.eup %1556 }
 0x4a1   :  { %v491_v18 = vmul.f32 %v1557_v15, %v395_v2 }
 0x504   :  { %v494_v16 = vpop.permute.xlu1 %493 }
 0x505   :  { %v496_v17 = vmul.f32 %v1557_v15, %v494_v16 }
 0x507   :  { %498 = vrot.lane.b32.xlu0 %v496_v17, %s1746_s13 }
 0x579   :  { %v499_v19 = vpop.permute.xlu0 %498 }
 0x57a   :  { %v501_v20 = vadd.f32 %v499_v19, %v491_v18  ;;  %v826_v19 = vld [vmem:[#allocation3 + $0x5] sm:$0x1] }
 0x57c   :  { %1558 = vtanh.f32 %v501_v20 }
 0x586   :  { %v1559_v21 = vpop.eup %1558 }
 0x587   :  { %504 = vrot.lane.b32.xlu1 %v1559_v21, %s1746_s13 }
 0x5f9   :  { %v505_v22 = vpop.permute.xlu1 %504 }
 0x5fa   :  { %v507_v23 = vmul.f32 %v1557_v15, %v505_v22 }
 0x5fc   :  { %509 = vrot.lane.b32.xlu0 %v507_v23, %s1749_s4 }
 0x66e   :  { %v510_v24 = vpop.permute.xlu0 %509 }
 0x66f   :  { %512 = vst.msk [vmem:[#allocation4 + $0x1] sm:$0x1] %vm406_vm5, %v510_v24  ;;  %1397 = vmatmul.mubr.msk.f32.vlgmr.msra.gmra.mrb[2].mxu0 %vm295_vm2, %v510_v24 }
 0x670   :  { %513 = vst.msk [vmem:[#allocation4 + $0x6] sm:$0x1] %vm408_vm6, %v510_v24  ;;  %1503 = vmatpush3.bf16.msra.mxu0 %v1918_v30  ;;  %1418 = vmatprep.mubr.msk.f32.mxu0 %vm1747_vm1, %v1748_v27 }
 0x671   :  { %1504 = vmatprep.subr.bf16.mxu0 %v1745_v0 }
 0x674   :  { %1506 = vmatpush3.bf16.msra.mxu0 %v1925_v35 }
 0x675   :  { %1513 = vmatprep.subr.bf16.mxu0 %v1745_v0 }
 0x742   :  { %v583_v26 = vpop.f32.mrb[2].mxu0 }
 0x743   :  { %v587_v28 = vadd.f32 %v583_v26, %v514_v25  ;;  %v1398_v29 = vpop.f32.mrb[3].mxu0 }
 0x745   :  { %1560 = vtanh.f32 %v587_v28  ;;  %v1280_v32 = vmul.f32 -1.442695, %v587_v28 }
 0x747   :  { %1562 = vpow2.f32 %v1280_v32 }
 0x74f   :  { %v1561_v31 = vpop.eup %1560 }
 0x750   :  { %597 = vrot.lane.b32.xlu1 %v1561_v31, %s1746_s13 }
 0x751   :  { %v1563_v33 = vpop.eup %1562 }
 0x752   :  { %v591_v34 = vadd.f32 1.0, %v1563_v33 }
 0x754   :  { %1564 = vrcp.f32 %v591_v34 }
 0x75e   :  { %v1565_v36 = vpop.eup %1564 }
 0x75f   :  { %v595_v39 = vmul.f32 %v1565_v36, %v501_v20 }
 0x7c2   :  { %v598_v37 = vpop.permute.xlu1 %597 }
 0x7c3   :  { %v600_v38 = vmul.f32 %v1565_v36, %v598_v37 }
 0x7c5   :  { %602 = vrot.lane.b32.xlu0 %v600_v38, %s1746_s13  ;;  %v930_v38 = vld [vmem:[#allocation3 + $0x6] sm:$0x1] }
 0x837   :  { %v603_v40 = vpop.permute.xlu0 %602 }
 0x838   :  { %v605_v41 = vadd.f32 %v603_v40, %v595_v39 }
 0x83a   :  { %1566 = vtanh.f32 %v605_v41 }
 0x844   :  { %v1567_v42 = vpop.eup %1566 }
 0x845   :  { %608 = vrot.lane.b32.xlu1 %v1567_v42, %s1746_s13 }
 0x8b7   :  { %v609_v43 = vpop.permute.xlu1 %608 }
 0x8b8   :  { %v611_v44 = vmul.f32 %v1565_v36, %v609_v43 }
 0x8ba   :  { %613 = vrot.lane.b32.xlu0 %v611_v44, %s1749_s4 }
 0x92c   :  { %v614_v45 = vpop.permute.xlu0 %613 }
 0x92d   :  { %616 = vst.msk [vmem:[#allocation4 + $0x2] sm:$0x1] %vm406_vm5, %v614_v45  ;;  %1408 = vmatmul.mubr.msk.f32.vlgmr.msra.gmra.mrb[4].mxu1 %vm295_vm2, %v614_v45 }
 0x92e   :  { %617 = vst.msk [vmem:[#allocation4 + $0x5] sm:$0x1] %vm408_vm6, %v614_v45  ;;  %1509 = vmatpush3.bf16.msra.mxu1 %v1918_v30  ;;  %1429 = vmatprep.mubr.msk.f32.mxu1 %vm1747_vm1, %v1748_v27 }
 0x92f   :  { %1510 = vmatprep.subr.bf16.mxu1 %v1745_v0 }
 0x932   :  { %1512 = vmatpush3.bf16.msra.mxu1 %v1925_v35 }
 0x933   :  { %1519 = vmatprep.subr.bf16.mxu1 %v1745_v0 }
 0xa00   :  { %v687_v47 = vpop.f32.mrb[4].mxu1 }
 0xa01   :  { %v691_v48 = vadd.f32 %v687_v47, %v618_v46  ;;  %v1409_v49 = vpop.f32.mrb[5].mxu1 }
 0xa03   :  { %1568 = vtanh.f32 %v691_v48  ;;  %v1282_v51 = vmul.f32 -1.442695, %v691_v48 }
 0xa05   :  { %1570 = vpow2.f32 %v1282_v51 }
 0xa0d   :  { %v1569_v50 = vpop.eup %1568 }
 0xa0e   :  { %701 = vrot.lane.b32.xlu1 %v1569_v50, %s1746_s13 }
 0xa0f   :  { %v1571_v52 = vpop.eup %1570 }
 0xa10   :  { %v695_v53 = vadd.f32 1.0, %v1571_v52 }
 0xa12   :  { %1572 = vrcp.f32 %v695_v53 }
 0xa1c   :  { %v1573_v54 = vpop.eup %1572 }
 0xa1d   :  { %v699_v57 = vmul.f32 %v1573_v54, %v605_v41 }
 0xa80   :  { %v702_v55 = vpop.permute.xlu1 %701 }
 0xa81   :  { %v704_v56 = vmul.f32 %v1573_v54, %v702_v55  ;;  %v1034_v55 = vld [vmem:[#allocation3 + $0x7] sm:$0x1] }
 0xa83   :  { %706 = vrot.lane.b32.xlu0 %v704_v56, %s1746_s13 }
 0xaf5   :  { %v707_v58 = vpop.permute.xlu0 %706 }
 0xaf6   :  { %v709_v59 = vadd.f32 %v707_v58, %v699_v57 }
 0xaf8   :  { %1574 = vtanh.f32 %v709_v59 }
 0xb02   :  { %v1575_v60 = vpop.eup %1574 }
 0xb03   :  { %712 = vrot.lane.b32.xlu1 %v1575_v60, %s1746_s13 }
 0xb75   :  { %v713_v61 = vpop.permute.xlu1 %712 }
 0xb76   :  { %v715_v62 = vmul.f32 %v1573_v54, %v713_v61 }
 0xb78   :  { %717 = vrot.lane.b32.xlu0 %v715_v62, %s1749_s4 }
 0xbea   :  { %v718_v63 = vpop.permute.xlu0 %717 }
 0xbeb   :  { %720 = vst.msk [vmem:[#allocation4 + $0x3] sm:$0x1] %vm406_vm5, %v718_v63  ;;  %1419 = vmatmul.mubr.msk.f32.vlgmr.msra.gmra.mrb[4].mxu0 %vm295_vm2, %v718_v63 }
 0xbec   :  { %721 = vst.msk [vmem:[#allocation4 + $0x4] sm:$0x1] %vm408_vm6, %v718_v63  ;;  %1515 = vmatpush3.bf16.msra.mxu0 %v1918_v30  ;;  %1440 = vmatprep.mubr.msk.f32.mxu0 %vm1747_vm1, %v1748_v27 }
 0xbed   :  { %1516 = vmatprep.subr.bf16.mxu0 %v1745_v0 }
 0xbf0   :  { %1518 = vmatpush3.bf16.msra.mxu0 %v1925_v35 }
 0xbf1   :  { %1525 = vmatprep.subr.bf16.mxu0 %v1745_v0 }
 0xcbe   :  { %v791_v2 = vpop.f32.mrb[4].mxu0 }
 0xcbf   :  { %v795_v3 = vadd.f32 %v791_v2, %v722_v1  ;;  %v1420_v4 = vpop.f32.mrb[5].mxu0 }
 0xcc1   :  { %1576 = vtanh.f32 %v795_v3  ;;  %v1284_v6 = vmul.f32 -1.442695, %v795_v3 }
 0xcc3   :  { %1578 = vpow2.f32 %v1284_v6 }
 0xccb   :  { %v1577_v5 = vpop.eup %1576 }
 0xccc   :  { %805 = vrot.lane.b32.xlu1 %v1577_v5, %s1746_s13 }
 0xccd   :  { %v1579_v7 = vpop.eup %1578 }
 0xcce   :  { %v799_v8 = vadd.f32 1.0, %v1579_v7  ;;  %v1139_v7 = vld [vmem:[#allocation13] sm:$0xff] }
 0xcd0   :  { %1580 = vrcp.f32 %v799_v8  ;;  %v1140_v8 = vld [vmem:[#allocation13 + $0x8] sm:$0xff] }
 0xcda   :  { %v1581_v9 = vpop.eup %1580 }
 0xcdb   :  { %v803_v12 = vmul.f32 %v1581_v9, %v709_v59 }
 0xd3e   :  { %v806_v10 = vpop.permute.xlu1 %805 }
 0xd3f   :  { %v808_v11 = vmul.f32 %v1581_v9, %v806_v10  ;;  %v1526_v10 = vpack.c.bf16 %v1140_v8, %v1139_v7 }
 0xd41   :  { %810 = vrot.lane.b32.xlu0 %v808_v11, %s1746_s13  ;;  %v1142_v11 = vld [vmem:[#allocation13 + $0x18] sm:$0xff] }
 0xdb3   :  { %v811_v13 = vpop.permute.xlu0 %810 }
 0xdb4   :  { %v813_v14 = vadd.f32 %v811_v13, %v803_v12 }
 0xdb6   :  { %1582 = vtanh.f32 %v813_v14 }
 0xdc0   :  { %v1583_v15 = vpop.eup %1582 }
 0xdc1   :  { %816 = vrot.lane.b32.xlu1 %v1583_v15, %s1746_s13 }
 0xe33   :  { %v817_v16 = vpop.permute.xlu1 %816 }
 0xe34   :  { %v819_v17 = vmul.f32 %v1581_v9, %v817_v16  ;;  %v1141_v9 = vld [vmem:[#allocation13 + $0x10] sm:$0xff] }
 0xe35   :  { %v1529_v12 = vpack.c.bf16 %v1142_v11, %v1141_v9 }
 0xe36   :  { %821 = vrot.lane.b32.xlu0 %v819_v17, %s1749_s4  ;;  %v1291_v17 = vld [vmem:[%s2074_s8] ss:$0 sm:$0xff] }
 0xea8   :  { %v822_v18 = vpop.permute.xlu0 %821 }
 0xea9   :  { %824 = vst.msk [vmem:[#allocation4 + $0x4] sm:$0x1] %vm406_vm5, %v822_v18  ;;  %1430 = vmatmul.mubr.msk.f32.vlgmr.msra.gmra.mrb[6].mxu1 %vm295_vm2, %v822_v18 }
 0xeaa   :  { %825 = vst.msk [vmem:[#allocation4 + $0x3] sm:$0x1] %vm408_vm6, %v822_v18  ;;  %1521 = vmatpush3.bf16.msra.mxu1 %v1918_v30  ;;  %1451 = vmatprep.mubr.msk.f32.mxu1 %vm1747_vm1, %v1748_v27 }
 0xeab   :  { %1522 = vmatprep.subr.bf16.mxu1 %v1745_v0 }
 0xeae   :  { %1524 = vmatpush3.bf16.msra.mxu1 %v1925_v35 }
 0xf7c   :  { %v895_v20 = vpop.f32.mrb[6].mxu1 }
 0xf7d   :  { %v899_v21 = vadd.f32 %v895_v20, %v826_v19  ;;  %v1431_v22 = vpop.f32.mrb[7].mxu1 }
 0xf7f   :  { %1584 = vtanh.f32 %v899_v21  ;;  %v1286_v24 = vmul.f32 -1.442695, %v899_v21 }
 0xf81   :  { %1586 = vpow2.f32 %v1286_v24 }
 0xf89   :  { %v1585_v23 = vpop.eup %1584 }
 0xf8a   :  { %909 = vrot.lane.b32.xlu1 %v1585_v23, %s1746_s13 }
 0xf8b   :  { %v1587_v25 = vpop.eup %1586 }
 0xf8c   :  { %v903_v26 = vadd.f32 1.0, %v1587_v25 }
 0xf8e   :  { %1588 = vrcp.f32 %v903_v26 }
 0xf98   :  { %v1589_v30 = vpop.eup %1588 }
 0xf99   :  { %v907_v31 = vmul.f32 %v1589_v30, %v813_v14 }
 0xffc   :  { %v910_v28 = vpop.permute.xlu1 %909 }
 0xffd   :  { %v912_v29 = vmul.f32 %v1589_v30, %v910_v28 }
 0xfff   :  { %914 = vrot.lane.b32.xlu0 %v912_v29, %s1746_s13 }
0x1071   :  { %v915_v35 = vpop.permute.xlu0 %914 }
0x1072   :  { %v917_v32 = vadd.f32 %v915_v35, %v907_v31 }
0x1074   :  { %1590 = vtanh.f32 %v917_v32 }
0x107e   :  { %v1591_v33 = vpop.eup %1590 }
0x107f   :  { %920 = vrot.lane.b32.xlu1 %v1591_v33, %s1746_s13 }
0x10f1   :  { %v921_v34 = vpop.permute.xlu1 %920 }
0x10f2   :  { %v923_v36 = vmul.f32 %v1589_v30, %v921_v34 }
0x10f4   :  { %925 = vrot.lane.b32.xlu0 %v923_v36, %s1749_s4 }
0x1166   :  { %v926_v37 = vpop.permute.xlu0 %925 }
0x1167   :  { %928 = vst.msk [vmem:[#allocation4 + $0x5] sm:$0x1] %vm406_vm5, %v926_v37  ;;  %1441 = vmatmul.mubr.msk.f32.vlgmr.msra.gmra.mrb[6].mxu0 %vm295_vm2, %v926_v37 }
0x1168   :  { %929 = vst.msk [vmem:[#allocation4 + $0x2] sm:$0x1] %vm408_vm6, %v926_v37  ;;  %1462 = vmatprep.mubr.msk.f32.mxu0 %vm1747_vm1, %v1748_v27  ;;  %1527 = vmatpush3.bf16.msra.mxu0 %v1526_v10 }
0x1169   :  { %1528 = vmatprep.subr.bf16.mxu0 %v1745_v0 }
0x116c   :  { %1530 = vmatpush3.bf16.msra.mxu0 %v1529_v12 }
0x123a   :  { %v999_v39 = vpop.f32.mrb[6].mxu0 }
0x123b   :  { %v1003_v40 = vadd.f32 %v999_v39, %v930_v38  ;;  %v1442_v41 = vpop.f32.mrb[7].mxu0 }
0x123d   :  { %1592 = vtanh.f32 %v1003_v40  ;;  %v1288_v43 = vmul.f32 -1.442695, %v1003_v40 }
0x123f   :  { %1594 = vpow2.f32 %v1288_v43 }
0x1247   :  { %v1593_v42 = vpop.eup %1592 }
0x1248   :  { %1013 = vrot.lane.b32.xlu1 %v1593_v42, %s1746_s13 }
0x1249   :  { %v1595_v44 = vpop.eup %1594 }
0x124a   :  { %v1007_v45 = vadd.f32 1.0, %v1595_v44 }
0x124c   :  { %1596 = vrcp.f32 %v1007_v45 }
0x1256   :  { %v1597_v46 = vpop.eup %1596 }
0x1257   :  { %v1011_v49 = vmul.f32 %v1597_v46, %v917_v32 }
0x12ba   :  { %v1014_v47 = vpop.permute.xlu1 %1013 }
0x12bb   :  { %v1016_v48 = vmul.f32 %v1597_v46, %v1014_v47 }
0x12bd   :  { %1018 = vrot.lane.b32.xlu0 %v1016_v48, %s1746_s13 }
0x132f   :  { %v1019_v27 = vpop.permute.xlu0 %1018 }
0x1330   :  { %v1021_v50 = vadd.f32 %v1019_v27, %v1011_v49 }
0x1332   :  { %1598 = vtanh.f32 %v1021_v50 }
0x133c   :  { %v1599_v51 = vpop.eup %1598 }
0x133d   :  { %1024 = vrot.lane.b32.xlu1 %v1599_v51, %s1746_s13 }
0x13af   :  { %v1025_v52 = vpop.permute.xlu1 %1024 }
0x13b0   :  { %v1027_v53 = vmul.f32 %v1597_v46, %v1025_v52 }
0x13b2   :  { %1029 = vrot.lane.b32.xlu0 %v1027_v53, %s1749_s4 }
0x1424   :  { %v1030_v54 = vpop.permute.xlu0 %1029 }
0x1425   :  { %1032 = vst.msk [vmem:[#allocation4 + $0x6] sm:$0x1] %vm406_vm5, %v1030_v54  ;;  %1452 = vmatmul.mubr.msk.f32.vlgmr.msra.gmra.mrb[8].mxu1 %vm295_vm2, %v1030_v54 }
0x1426   :  { %1033 = vst.msk [vmem:[#allocation4 + $0x1] sm:$0x1] %vm408_vm6, %v1030_v54 }
0x14f8   :  { %v1103_v56 = vpop.f32.mrb[8].mxu1 }
0x14f9   :  { %v1107_v57 = vadd.f32 %v1103_v56, %v1034_v55  ;;  %v1453_v58 = vpop.f32.mrb[9].mxu1 }
0x14fb   :  { %1600 = vtanh.f32 %v1107_v57  ;;  %v1290_v60 = vmul.f32 -1.442695, %v1107_v57 }
0x14fd   :  { %1602 = vpow2.f32 %v1290_v60 }
0x1505   :  { %v1601_v59 = vpop.eup %1600 }
0x1506   :  { %1117 = vrot.lane.b32.xlu1 %v1601_v59, %s1746_s13 }
0x1507   :  { %v1603_v61 = vpop.eup %1602 }
0x1508   :  { %v1111_v62 = vadd.f32 1.0, %v1603_v61 }
0x150a   :  { %1604 = vrcp.f32 %v1111_v62 }
0x1514   :  { %v1605_v63 = vpop.eup %1604 }
0x1515   :  { %v1115_v3 = vmul.f32 %v1605_v63, %v1021_v50 }
0x1578   :  { %v1118_v1 = vpop.permute.xlu1 %1117 }
0x1579   :  { %v1120_v2 = vmul.f32 %v1605_v63, %v1118_v1 }
0x157b   :  { %1122 = vrot.lane.b32.xlu0 %v1120_v2, %s1746_s13 }
0x15ed   :  { %v1123_v4 = vpop.permute.xlu0 %1122 }
0x15ee   :  { %v1125_v5 = vadd.f32 %v1123_v4, %v1115_v3 }
0x15f0   :  { %1606 = vtanh.f32 %v1125_v5 }
0x15fa   :  { %v1607_v6 = vpop.eup %1606 }
0x15fb   :  { %1128 = vrot.lane.b32.xlu1 %v1607_v6, %s1746_s13 }
0x166d   :  { %v1129_v13 = vpop.permute.xlu1 %1128 }
0x166e   :  { %v1131_v14 = vmul.f32 %v1605_v63, %v1129_v13 }
0x1670   :  { %1133 = vrot.lane.b32.xlu0 %v1131_v14, %s1749_s4 }
0x16e2   :  { %v1134_v15 = vpop.permute.xlu0 %1133 }
0x16e3   :  { %1136 = vst.msk [vmem:[#allocation4 + $0x7] sm:$0x1] %vm406_vm5, %v1134_v15 }
0x16e4   :  { %1137 = vst.msk [vmem:[#allocation4] sm:$0x1] %vm408_vm6, %v1134_v15 }
0x16eb   :  { %v1138_v16 = vld [vmem:[#allocation4] sm:$0xff] }
0x16ec   :  { %1463 = vmatmul.mubr.msk.f32.vlgmr.msra.gmra.mrb[8].mxu0 %vm295_vm2, %v1138_v16 }
0x17bf   :  { %v1219_v0 = vpop.f32.mrb[8].mxu0 }
0x17c0   :  { %v1220_v18 = vadd.f32 %v1291_v17, %v1219_v0  ;;  %v1464_v19 = vpop.f32.mrb[9].mxu0 }
0x17c2   :  { %1223 = vst [vmem:[#allocation15] sm:$0xff] %v1220_v18 }
0x17c3   :  { %1717 = shalt.err (!%p1714_p11)
}
0x17c4   :  { %s1718_s29 = scalar_lea.hbm %s2075_s9, 128 }
0x17c5   :  { %p1719_p12 = scmp.ne.s32.totalorder %s2075_s9, %s1718_s29  ;;  %p1722_p13 = scmp.lt.u32.totalorder %s1718_s29, %s2075_s9 }
0x17c7   :  { %p1724_p0 = pnand %p1722_p13, %p1719_p12 }
0x17c9   :  { %1727 = shalt.err (!%p1724_p0)
}
0x17ca   :  { %1233 = dma.vmem_to_hbm [thread:$0]  %s1231_s3, 128, %s2075_s9, [#allocation7]  }
0x17cb   :  { %1736 = dma.done.wait [#allocation7], 128  }
0x17cc   :  { %1737 = vsyncadd [#allocation7], 4294967168 }
0x17cd   :  { %1237 = vsyncpa [#allocation6], 1 }
0x17ce   :  { %1238 = vsyncpa [#allocation11], 1 }
0x17cf   :  { %1239 = vsyncpa [#allocation14], 1 }
0x17d0   :  { %1240 = vsyncpa [#allocation7], 1 }
0x17d1   :  { %1241 = vsyncpa [#allocation8], 1 }

</bundles_post_ra>
